<compile_context>
chip_gen: v7x
topology: tpu7x:2x2x1
jax: 0.10.0
libtpu: 0.0.40
codegen_flags: <defaults>
</compile_context>

<pallas_src>
import functools
import math

import jax
import jax.numpy as jnp
from jax.experimental import pallas as pl
from jax.experimental.pallas import tpu as pltpu


def _pick_tile(n, preferred):
    """Largest divisor of n that is <= preferred (falls back to n)."""
    if n <= preferred:
        return n
    for t in range(preferred, 0, -1):
        if n % t == 0:
            return t
    return n


# ---------------------------------------------------------------------------
# Kernel 1: tiled dense linear  y = x @ W + b   (used for w_qs / w_ks / w_vs)
# ---------------------------------------------------------------------------
def _linear_kernel(x_ref, w_ref, b_ref, o_ref, acc_ref):
    kk = pl.program_id(2)

    @pl.when(kk == 0)
    def _():
        acc_ref[...] = jnp.zeros_like(acc_ref)

    acc_ref[...] += jnp.dot(x_ref[...], w_ref[...],
                            preferred_element_type=jnp.float32)

    @pl.when(kk == pl.num_programs(2) - 1)
    def _():
        o_ref[...] = (acc_ref[...] + b_ref[...]).astype(o_ref.dtype)


def pallas_linear(x, w, b, *, tm=256, tn=256, tk=512):
    # x: (M, K), w: (K, N), b: (1, N) f32
    M, K = x.shape
    N = w.shape[1]
    tm = _pick_tile(M, tm)
    tn = _pick_tile(N, tn)
    tk = _pick_tile(K, tk)
    return pl.pallas_call(
        _linear_kernel,
        out_shape=jax.ShapeDtypeStruct((M, N), x.dtype),
        grid=(M // tm, N // tn, K // tk),
        in_specs=[
            pl.BlockSpec((tm, tk), lambda i, j, kk: (i, kk)),
            pl.BlockSpec((tk, tn), lambda i, j, kk: (kk, j)),
            pl.BlockSpec((1, tn), lambda i, j, kk: (0, j)),
        ],
        out_specs=pl.BlockSpec((tm, tn), lambda i, j, kk: (i, j)),
        scratch_shapes=[pltpu.VMEM((tm, tn), jnp.float32)],
        compiler_params=pltpu.CompilerParams(
            dimension_semantics=("parallel", "parallel", "arbitrary")),
    )(x, w, b)


# ---------------------------------------------------------------------------
# Kernel 2: scaled dot-product attention.
#   Grid: (batch_blocks, n_head).  q/k/v stay in (bs, L, d_model) layout; the
#   BlockSpec index_map slices head h on the lane axis.  Mask is the original
#   (bs, L, L) tensor, shared across heads (no replication).
# ---------------------------------------------------------------------------
def _attn_kernel(q_ref, k_ref, v_ref, m_ref, o_ref, a_ref, *, scale):
    q = q_ref[...] * scale                    # fold 1/temperature into q
    k = k_ref[...]
    v = v_ref[...]

    # scores: contraction on the last dim of both (no materialized k.T)
    s = jnp.einsum('bqd,bkd->bqk', q, k, preferred_element_type=jnp.float32)

    masked = m_ref[...] != 0                  # True = masked position
    s = jnp.where(masked, -1e30, s)           # finite fill: no inf-inf NaN
    s = s - jnp.max(s, axis=-1, keepdims=True)
    p = jnp.exp(s)
    denom = jnp.sum(p, axis=-1, keepdims=True)
    p = p * pl.reciprocal(denom, approx=True)

    a_ref[...] = p.astype(a_ref.dtype)
    o_ref[...] = jnp.einsum('bqk,bkd->bqd', p.astype(v.dtype), v,
                            preferred_element_type=jnp.float32
                            ).astype(o_ref.dtype)


def pallas_attention(q, k, v, mask_i, scale, *, n_head, block_bs=None):
    # q/k/v: (bs, L, d_model)   mask_i: (bs, L, L) int32 (1 = masked)
    bs, L, d_model = q.shape
    hd = d_model // n_head
    if block_bs is None:
        block_bs = _pick_tile(bs, 4)          # batch several slices per step
    nb = bs // block_bs

    kern = functools.partial(_attn_kernel, scale=scale)
    ctx, attn = pl.pallas_call(
        kern,
        out_shape=(
            jax.ShapeDtypeStruct((bs, L, d_model), q.dtype),
            jax.ShapeDtypeStruct((n_head * bs, L, L), jnp.float32),
        ),
        grid=(nb, n_head),
        in_specs=[
            pl.BlockSpec((block_bs, L, hd), lambda i, h: (i, 0, h)),
            pl.BlockSpec((block_bs, L, hd), lambda i, h: (i, 0, h)),
            pl.BlockSpec((block_bs, L, hd), lambda i, h: (i, 0, h)),
            pl.BlockSpec((block_bs, L, L), lambda i, h: (i, 0, 0)),
        ],
        out_specs=(
            pl.BlockSpec((block_bs, L, hd), lambda i, h: (i, 0, h)),
            # torch layout: attn row index = h * bs + b  (head-major)
            pl.BlockSpec((block_bs, L, L), lambda i, h: (h * nb + i, 0, 0)),
        ),
        compiler_params=pltpu.CompilerParams(
            dimension_semantics=("parallel", "parallel")),
    )(q, k, v, mask_i)
    return ctx, attn


# ---------------------------------------------------------------------------
# Kernel 3: fc projection + residual add + LayerNorm (eps = 1e-5)
#   Tiled over rows (M) and the contraction (K); LayerNorm runs on the final
#   K step over the full feature row held in the VMEM accumulator.
# ---------------------------------------------------------------------------
def _fc_res_ln_kernel(x_ref, w_ref, b_ref, res_ref, g_ref, beta_ref,
                      o_ref, acc_ref):
    kk = pl.program_id(1)

    @pl.when(kk == 0)
    def _():
        acc_ref[...] = jnp.zeros_like(acc_ref)

    acc_ref[...] += jnp.dot(x_ref[...], w_ref[...],
                            preferred_element_type=jnp.float32)

    @pl.when(kk == pl.num_programs(1) - 1)
    def _():
        y = acc_ref[...] + b_ref[...] + res_ref[...].astype(jnp.float32)
        mean = jnp.mean(y, axis=-1, keepdims=True)
        var = jnp.mean(jnp.square(y - mean), axis=-1, keepdims=True)
        yn = (y - mean) * jax.lax.rsqrt(var + 1e-5)
        o_ref[...] = (yn * g_ref[...] + beta_ref[...]).astype(o_ref.dtype)


def pallas_fc_res_ln(x, w, b, residual, gamma, beta, *, tm=256, tk=512):
    M, K = x.shape
    D = w.shape[1]
    tm = _pick_tile(M, tm)
    tk = _pick_tile(K, tk)
    return pl.pallas_call(
        _fc_res_ln_kernel,
        out_shape=jax.ShapeDtypeStruct((M, D), jnp.float32),
        grid=(M // tm, K // tk),
        in_specs=[
            pl.BlockSpec((tm, tk), lambda i, kk: (i, kk)),   # x
            pl.BlockSpec((tk, D), lambda i, kk: (kk, 0)),    # w
            pl.BlockSpec((1, D), lambda i, kk: (0, 0)),      # b
            pl.BlockSpec((tm, D), lambda i, kk: (i, 0)),     # residual
            pl.BlockSpec((1, D), lambda i, kk: (0, 0)),      # gamma
            pl.BlockSpec((1, D), lambda i, kk: (0, 0)),      # beta
        ],
        out_specs=pl.BlockSpec((tm, D), lambda i, kk: (i, 0)),
        scratch_shapes=[pltpu.VMEM((tm, D), jnp.float32)],
        compiler_params=pltpu.CompilerParams(
            dimension_semantics=("parallel", "arbitrary")),
    )(x, w, b, residual, gamma, beta)


# ---------------------------------------------------------------------------
# MultiHeadAttention forward (glue in plain JAX, hot paths in Pallas kernels)
# ---------------------------------------------------------------------------
def multi_head_attention(params, q, k, v, mask, *, n_head,
                         compute_dtype=jnp.float32):
    # compute_dtype=jnp.bfloat16 is recommended on v6e/v7x for the matmuls
    # (accumulation stays f32); default keeps exact f32 module semantics.
    bs, L, d_model = q.shape
    head_dim = d_model // n_head
    scale = 1.0 / math.sqrt(head_dim)

    cast = lambda t: t.astype(compute_dtype)
    M = bs * L

    q2 = q.reshape(M, d_model)
    k2 = k.reshape(M, d_model)
    v2 = v.reshape(M, d_model)

    # Projections (tiled matmuls).  Outputs stay in (bs, L, d_model) layout;
    # no per-head transpose/reshape round trips are needed.
    qp = pallas_linear(cast(q2), cast(params["w_q"]), params["b_q"])
    kp = pallas_linear(cast(k2), cast(params["w_k"]), params["b_k"])
    vp = pallas_linear(cast(v2), cast(params["w_v"]), params["b_v"])
    qp = qp.reshape(bs, L, d_model)
    kp = kp.reshape(bs, L, d_model)
    vp = vp.reshape(bs, L, d_model)

    # Original (bs, L, L) mask, no n_head replication, no f32 blow-up.
    mask_i = mask.astype(jnp.int32)

    ctx, attn = pallas_attention(qp, kp, vp, mask_i, scale, n_head=n_head)
    # ctx is already (bs, L, d_model) with heads interleaved exactly like the
    # torch permute(1,2,0,3).view(bs, L, d_model).

    # fc -> (dropout: identity in eval) -> residual add -> layer norm
    output = pallas_fc_res_ln(
        cast(ctx.reshape(M, d_model)),
        cast(params["w_fc"]), params["b_fc"],
        q.reshape(M, d_model),
        params["ln_gamma"], params["ln_beta"],
    ).reshape(bs, L, d_model)

    return output, attn


# ---------------------------------------------------------------------------
# Deterministic parameter init (nn.Linear-style uniform, LayerNorm defaults)
# ---------------------------------------------------------------------------
def init_params(key, d_model):
    keys = jax.random.split(key, 8)
    bound = 1.0 / math.sqrt(d_model)

    def lin(kw, kb):
        w = jax.random.uniform(kw, (d_model, d_model), jnp.float32, -bound, bound)
        b = jax.random.uniform(kb, (1, d_model), jnp.float32, -bound, bound)
        return w, b

    w_q, b_q = lin(keys[0], keys[1])
    w_k, b_k = lin(keys[2], keys[3])
    w_v, b_v = lin(keys[4], keys[5])
    w_fc, b_fc = lin(keys[6], keys[7])
    return {
        "w_q": w_q, "b_q": b_q,
        "w_k": w_k, "b_k": b_k,
        "w_v": w_v, "b_v": b_v,
        "w_fc": w_fc, "b_fc": b_fc,
        "ln_gamma": jnp.ones((1, d_model), jnp.float32),
        "ln_beta": jnp.zeros((1, d_model), jnp.float32),
    }


if __name__ == "__main__":
    # Module defaults: n_head=2, d_model=256 -> head_dim=128 (lane-aligned).
    n_head = 2
    d_model = 256
    bs = 2
    seq_len = 8

    root = jax.random.PRNGKey(0)
    kp, kq, kk, kv = jax.random.split(root, 4)

    params = init_params(kp, d_model)
    q = jax.random.normal(kq, (bs, seq_len, d_model), jnp.float32)
    k = jax.random.normal(kk, (bs, seq_len, d_model), jnp.float32)
    v = jax.random.normal(kv, (bs, seq_len, d_model), jnp.float32)

    # Subsequent (causal) mask: True = position to be masked out.
    idx = jnp.arange(seq_len)
    mask = (idx[None, :] > idx[:, None])[None, :, :]            # (1, L, L)
    mask = jnp.broadcast_to(mask, (bs, seq_len, seq_len))       # (bs, L, L)

    fwd = jax.jit(functools.partial(multi_head_attention, n_head=n_head))
    output, attn = fwd(params, q, k, v, mask)
    jax.block_until_ready((output, attn))

    assert output.shape == (bs, seq_len, d_model)
    assert attn.shape == (n_head * bs, seq_len, seq_len)
    assert bool(jnp.all(jnp.isfinite(output)))
    assert bool(jnp.all(jnp.isfinite(attn)))
    # softmax rows sum to ~1 (approx reciprocal => loose tolerance)
    assert bool(jnp.allclose(jnp.sum(attn, axis=-1), 1.0, atol=1e-2))
    # causal structure respected: upper triangle of attn is (near) zero
    assert bool(jnp.max(jnp.abs(attn * mask[:1].astype(jnp.float32))) < 1e-6)

    print("KERNEL_OK")
</pallas_src>

<mosaic_0001>
module attributes {stable_mosaic.version = 11 : i64} {
  func.func @_attn_kernel(%arg0: i32, %arg1: i32, %arg2: memref<2x8x128xf32, #tpu.memory_space<vmem>>, %arg3: memref<2x8x128xf32, #tpu.memory_space<vmem>>, %arg4: memref<2x8x128xf32, #tpu.memory_space<vmem>>, %arg5: memref<2x8x8xi32, #tpu.memory_space<vmem>>, %arg6: memref<2x8x128xf32, #tpu.memory_space<vmem>>, %arg7: memref<2x8x8xf32, #tpu.memory_space<vmem>>) attributes {dimension_semantics = [#tpu.dimension_semantics<parallel>, #tpu.dimension_semantics<parallel>], iteration_bounds = array<i64: 1, 2>, scalar_prefetch = 0 : i64, scratch_operands = 0 : i64, tpu.core_type = #tpu.core_type<tc>, window_params = [{transform_indices = @transform_0, window_bounds = array<i64: 2, 8, 128>}, {transform_indices = @transform_1, window_bounds = array<i64: 2, 8, 128>}, {transform_indices = @transform_2, window_bounds = array<i64: 2, 8, 128>}, {transform_indices = @transform_3, window_bounds = array<i64: 2, 8, 8>}, {transform_indices = @transform_4, window_bounds = array<i64: 2, 8, 128>}, {transform_indices = @transform_5, window_bounds = array<i64: 2, 8, 8>}]} {
    %c0 = arith.constant 0 : index
    %c0_0 = arith.constant 0 : index
    %c0_1 = arith.constant 0 : index
    %0 = vector.load %arg2[%c0, %c0_0, %c0_1] : memref<2x8x128xf32, #tpu.memory_space<vmem>>, vector<2x8x128xf32>
    %cst = arith.constant 0.0883883461 : f32
    %1 = vector.broadcast %cst : f32 to vector<2x8x128xf32>
    %2 = arith.mulf %0, %1 : vector<2x8x128xf32>
    %c0_2 = arith.constant 0 : index
    %c0_3 = arith.constant 0 : index
    %c0_4 = arith.constant 0 : index
    %3 = vector.load %arg3[%c0_2, %c0_3, %c0_4] : memref<2x8x128xf32, #tpu.memory_space<vmem>>, vector<2x8x128xf32>
    %c0_5 = arith.constant 0 : index
    %c0_6 = arith.constant 0 : index
    %c0_7 = arith.constant 0 : index
    %4 = vector.load %arg4[%c0_5, %c0_6, %c0_7] : memref<2x8x128xf32, #tpu.memory_space<vmem>>, vector<2x8x128xf32>
    "tpu.trace_start"() <{level = 10 : i32, message = "bqd,bkd->bqk"}> : () -> ()
    %cst_8 = arith.constant dense<0.000000e+00> : vector<2x8x8xf32>
    %5 = tpu.matmul %2, %3, %cst_8 {dimension_numbers = #tpu.dot_dimension_numbers<[2], [2], [1], [1], [0, 0, 0, 1, 1, 1], [0], [0]>} : vector<2x8x128xf32>, vector<2x8x128xf32>, vector<2x8x8xf32> -> vector<2x8x8xf32>
    "tpu.trace_stop"() : () -> ()
    %c0_9 = arith.constant 0 : index
    %c0_10 = arith.constant 0 : index
    %c0_11 = arith.constant 0 : index
    %6 = vector.load %arg5[%c0_9, %c0_10, %c0_11] : memref<2x8x8xi32, #tpu.memory_space<vmem>>, vector<2x8x8xi32>
    %c0_i32 = arith.constant 0 : i32
    %7 = vector.broadcast %c0_i32 : i32 to vector<2x8x8xi32>
    %8 = arith.cmpi ne, %6, %7 : vector<2x8x8xi32>
    %cst_12 = arith.constant -1.000000e+30 : f32
    %9 = vector.broadcast %cst_12 : f32 to vector<2x8x8xf32>
    %10 = arith.select %8, %9, %5 : vector<2x8x8xi1>, vector<2x8x8xf32>
    %cst_13 = arith.constant dense<0xFF800000> : vector<2x8xf32>
    %11 = vector.multi_reduction <maximumf>, %10, %cst_13 [2] : vector<2x8x8xf32> to vector<2x8xf32>
    %12 = vector.shape_cast %11 : vector<2x8xf32> to vector<2x8x1xf32>
    %13 = vector.broadcast %12 : vector<2x8x1xf32> to vector<2x8x8xf32>
    %14 = arith.subf %10, %13 : vector<2x8x8xf32>
    %15 = math.exp %14 : vector<2x8x8xf32>
    %cst_14 = arith.constant dense<0.000000e+00> : vector<2x8xf32>
    %16 = vector.multi_reduction <add>, %15, %cst_14 [2] : vector<2x8x8xf32> to vector<2x8xf32>
    %17 = vector.shape_cast %16 : vector<2x8xf32> to vector<2x8x1xf32>
    %18 = tpu.reciprocal %17 {approx = true} : vector<2x8x1xf32> -> vector<2x8x1xf32>
    %19 = vector.broadcast %18 : vector<2x8x1xf32> to vector<2x8x8xf32>
    %20 = arith.mulf %15, %19 : vector<2x8x8xf32>
    %c0_15 = arith.constant 0 : index
    %c0_16 = arith.constant 0 : index
    %c0_17 = arith.constant 0 : index
    %21 = vector.load %arg7[%c0_15, %c0_16, %c0_17] : memref<2x8x8xf32, #tpu.memory_space<vmem>>, vector<2x8x8xf32>
    tpu.vector_store %arg7[%c0_15, %c0_16, %c0_17], %20 {strides = array<i32>} : memref<2x8x8xf32, #tpu.memory_space<vmem>>, vector<2x8x8xf32>,
    "tpu.trace_start"() <{level = 10 : i32, message = "bqk,bkd->bqd"}> : () -> ()
    %cst_18 = arith.constant dense<0.000000e+00> : vector<2x8x128xf32>
    %22 = tpu.matmul %20, %4, %cst_18 {dimension_numbers = #tpu.dot_dimension_numbers<[2], [1], [1], [2], [0, 0, 0, 1, 1, 2], [0], [0]>} : vector<2x8x8xf32>, vector<2x8x128xf32>, vector<2x8x128xf32> -> vector<2x8x128xf32>
    "tpu.trace_stop"() : () -> ()
    %c0_19 = arith.constant 0 : index
    %c0_20 = arith.constant 0 : index
    %c0_21 = arith.constant 0 : index
    %23 = vector.load %arg6[%c0_19, %c0_20, %c0_21] : memref<2x8x128xf32, #tpu.memory_space<vmem>>, vector<2x8x128xf32>
    tpu.vector_store %arg6[%c0_19, %c0_20, %c0_21], %22 {strides = array<i32>} : memref<2x8x128xf32, #tpu.memory_space<vmem>>, vector<2x8x128xf32>,
    return
  }
  func.func @transform_0(%arg0: i32, %arg1: i32) -> (i32, i32, i32) {
    %c0_i32 = arith.constant 0 : i32
    %c0_i32_0 = arith.constant 0 : i32
    return %arg0, %c0_i32, %arg1 : i32, i32, i32
  }
  func.func @transform_1(%arg0: i32, %arg1: i32) -> (i32, i32, i32) {
    %c0_i32 = arith.constant 0 : i32
    %c0_i32_0 = arith.constant 0 : i32
    return %arg0, %c0_i32, %arg1 : i32, i32, i32
  }
  func.func @transform_2(%arg0: i32, %arg1: i32) -> (i32, i32, i32) {
    %c0_i32 = arith.constant 0 : i32
    %c0_i32_0 = arith.constant 0 : i32
    return %arg0, %c0_i32, %arg1 : i32, i32, i32
  }
  func.func @transform_3(%arg0: i32, %arg1: i32) -> (i32, i32, i32) {
    %c0_i32 = arith.constant 0 : i32
    %c0_i32_0 = arith.constant 0 : i32
    %c0_i32_1 = arith.constant 0 : i32
    return %arg0, %c0_i32, %c0_i32_0 : i32, i32, i32
  }
  func.func @transform_4(%arg0: i32, %arg1: i32) -> (i32, i32, i32) {
    %c0_i32 = arith.constant 0 : i32
    %c0_i32_0 = arith.constant 0 : i32
    return %arg0, %c0_i32, %arg1 : i32, i32, i32
  }
  func.func @transform_5(%arg0: i32, %arg1: i32) -> (i32, i32, i32) {
    %c1_i32 = arith.constant 1 : i32
    %0 = arith.muli %arg1, %c1_i32 : i32
    %1 = arith.addi %0, %arg0 : i32
    %c0_i32 = arith.constant 0 : i32
    %c0_i32_0 = arith.constant 0 : i32
    %c0_i32_1 = arith.constant 0 : i32
    return %1, %c0_i32, %c0_i32_0 : i32, i32, i32
  }
}

module attributes {stable_mosaic.version = 11 : i64} {
  func.func @_linear_kernel(%arg0: i32, %arg1: i32, %arg2: i32, %arg3: memref<16x256xf32, #tpu.memory_space<vmem>>, %arg4: memref<256x256xf32, #tpu.memory_space<vmem>>, %arg5: memref<1x256xf32, #tpu.memory_space<vmem>>, %arg6: memref<16x256xf32, #tpu.memory_space<vmem>>, %arg7: memref<16x256xf32, #tpu.memory_space<vmem>>) attributes {dimension_semantics = [#tpu.dimension_semantics<parallel>, #tpu.dimension_semantics<parallel>, #tpu.dimension_semantics<arbitrary>], iteration_bounds = array<i64: 1, 1, 1>, scalar_prefetch = 0 : i64, scratch_operands = 1 : i64, tpu.core_type = #tpu.core_type<tc>, window_params = [{transform_indices = @transform_0, window_bounds = array<i64: 16, 256>}, {transform_indices = @transform_1, window_bounds = array<i64: 256, 256>}, {transform_indices = @transform_2, window_bounds = array<i64: 1, 256>}, {transform_indices = @transform_3, window_bounds = array<i64: 16, 256>}]} {
    %c0_i32 = arith.constant 0 : i32
    %0 = arith.cmpi eq, %arg2, %c0_i32 : i32
    %1 = arith.extui %0 : i1 to i32
    %c0_i32_0 = arith.constant 0 : i32
    %2 = arith.cmpi ne, %1, %c0_i32_0 : i32
    scf.if %2 {
      %cst_10 = arith.constant 0.000000e+00 : f32
      %12 = vector.broadcast %cst_10 : f32 to vector<16x256xf32>
      %c0_11 = arith.constant 0 : index
      %c0_12 = arith.constant 0 : index
      %13 = vector.load %arg7[%c0_11, %c0_12] : memref<16x256xf32, #tpu.memory_space<vmem>>, vector<16x256xf32>
      tpu.vector_store %arg7[%c0_11, %c0_12], %12 {strides = array<i32>} : memref<16x256xf32, #tpu.memory_space<vmem>>, vector<16x256xf32>,
    } else {
    }
    %c0 = arith.constant 0 : index
    %c0_1 = arith.constant 0 : index
    %3 = vector.load %arg7[%c0, %c0_1] : memref<16x256xf32, #tpu.memory_space<vmem>>, vector<16x256xf32>
    %c0_2 = arith.constant 0 : index
    %c0_3 = arith.constant 0 : index
    %4 = vector.load %arg3[%c0_2, %c0_3] : memref<16x256xf32, #tpu.memory_space<vmem>>, vector<16x256xf32>
    %c0_4 = arith.constant 0 : index
    %c0_5 = arith.constant 0 : index
    %5 = vector.load %arg4[%c0_4, %c0_5] : memref<256x256xf32, #tpu.memory_space<vmem>>, vector<256x256xf32>
    %cst = arith.constant dense<0.000000e+00> : vector<16x256xf32>
    %6 = tpu.matmul %4, %5, %cst {dimension_numbers = #tpu.dot_dimension_numbers<[1], [0], [0], [1], [0, 0, 1, 1], [], []>} : vector<16x256xf32>, vector<256x256xf32>, vector<16x256xf32> -> vector<16x256xf32>
    %7 = arith.addf %3, %6 : vector<16x256xf32>
    %c0_6 = arith.constant 0 : index
    %c0_7 = arith.constant 0 : index
    %8 = vector.load %arg7[%c0_6, %c0_7] : memref<16x256xf32, #tpu.memory_space<vmem>>, vector<16x256xf32>
    tpu.vector_store %arg7[%c0_6, %c0_7], %7 {strides = array<i32>} : memref<16x256xf32, #tpu.memory_space<vmem>>, vector<16x256xf32>,
    %c0_i32_8 = arith.constant 0 : i32
    %9 = arith.cmpi eq, %arg2, %c0_i32_8 : i32
    %10 = arith.extui %9 : i1 to i32
    %c0_i32_9 = arith.constant 0 : i32
    %11 = arith.cmpi ne, %10, %c0_i32_9 : i32
    scf.if %11 {
      %c0_10 = arith.constant 0 : index
      %c0_11 = arith.constant 0 : index
      %12 = vector.load %arg7[%c0_10, %c0_11] : memref<16x256xf32, #tpu.memory_space<vmem>>, vector<16x256xf32>
      %c0_12 = arith.constant 0 : index
      %c0_13 = arith.constant 0 : index
      %13 = vector.load %arg5[%c0_12, %c0_13] : memref<1x256xf32, #tpu.memory_space<vmem>>, vector<1x256xf32>
      %14 = vector.broadcast %13 : vector<1x256xf32> to vector<16x256xf32>
      %15 = arith.addf %12, %14 : vector<16x256xf32>
      %c0_14 = arith.constant 0 : index
      %c0_15 = arith.constant 0 : index
      %16 = vector.load %arg6[%c0_14, %c0_15] : memref<16x256xf32, #tpu.memory_space<vmem>>, vector<16x256xf32>
      tpu.vector_store %arg6[%c0_14, %c0_15], %15 {strides = array<i32>} : memref<16x256xf32, #tpu.memory_space<vmem>>, vector<16x256xf32>,
    } else {
    }
    return
  }
  func.func @transform_0(%arg0: i32, %arg1: i32, %arg2: i32) -> (i32, i32) {
    %c0_i32 = arith.constant 0 : i32
    return %arg0, %arg2 : i32, i32
  }
  func.func @transform_1(%arg0: i32, %arg1: i32, %arg2: i32) -> (i32, i32) {
    %c0_i32 = arith.constant 0 : i32
    return %arg2, %arg1 : i32, i32
  }
  func.func @transform_2(%arg0: i32, %arg1: i32, %arg2: i32) -> (i32, i32) {
    %c0_i32 = arith.constant 0 : i32
    %c0_i32_0 = arith.constant 0 : i32
    return %c0_i32, %arg1 : i32, i32
  }
  func.func @transform_3(%arg0: i32, %arg1: i32, %arg2: i32) -> (i32, i32) {
    %c0_i32 = arith.constant 0 : i32
    return %arg0, %arg1 : i32, i32
  }
}

module attributes {stable_mosaic.version = 11 : i64} {
  func.func @_linear_kernel(%arg0: i32, %arg1: i32, %arg2: i32, %arg3: memref<16x256xf32, #tpu.memory_space<vmem>>, %arg4: memref<256x256xf32, #tpu.memory_space<vmem>>, %arg5: memref<1x256xf32, #tpu.memory_space<vmem>>, %arg6: memref<16x256xf32, #tpu.memory_space<vmem>>, %arg7: memref<16x256xf32, #tpu.memory_space<vmem>>) attributes {dimension_semantics = [#tpu.dimension_semantics<parallel>, #tpu.dimension_semantics<parallel>, #tpu.dimension_semantics<arbitrary>], iteration_bounds = array<i64: 1, 1, 1>, scalar_prefetch = 0 : i64, scratch_operands = 1 : i64, tpu.core_type = #tpu.core_type<tc>, window_params = [{transform_indices = @transform_0, window_bounds = array<i64: 16, 256>}, {transform_indices = @transform_1, window_bounds = array<i64: 256, 256>}, {transform_indices = @transform_2, window_bounds = array<i64: 1, 256>}, {transform_indices = @transform_3, window_bounds = array<i64: 16, 256>}]} {
    %c0_i32 = arith.constant 0 : i32
    %0 = arith.cmpi eq, %arg2, %c0_i32 : i32
    %1 = arith.extui %0 : i1 to i32
    %c0_i32_0 = arith.constant 0 : i32
    %2 = arith.cmpi ne, %1, %c0_i32_0 : i32
    scf.if %2 {
      %cst_10 = arith.constant 0.000000e+00 : f32
      %12 = vector.broadcast %cst_10 : f32 to vector<16x256xf32>
      %c0_11 = arith.constant 0 : index
      %c0_12 = arith.constant 0 : index
      %13 = vector.load %arg7[%c0_11, %c0_12] : memref<16x256xf32, #tpu.memory_space<vmem>>, vector<16x256xf32>
      tpu.vector_store %arg7[%c0_11, %c0_12], %12 {strides = array<i32>} : memref<16x256xf32, #tpu.memory_space<vmem>>, vector<16x256xf32>,
    } else {
    }
    %c0 = arith.constant 0 : index
    %c0_1 = arith.constant 0 : index
    %3 = vector.load %arg7[%c0, %c0_1] : memref<16x256xf32, #tpu.memory_space<vmem>>, vector<16x256xf32>
    %c0_2 = arith.constant 0 : index
    %c0_3 = arith.constant 0 : index
    %4 = vector.load %arg3[%c0_2, %c0_3] : memref<16x256xf32, #tpu.memory_space<vmem>>, vector<16x256xf32>
    %c0_4 = arith.constant 0 : index
    %c0_5 = arith.constant 0 : index
    %5 = vector.load %arg4[%c0_4, %c0_5] : memref<256x256xf32, #tpu.memory_space<vmem>>, vector<256x256xf32>
    %cst = arith.constant dense<0.000000e+00> : vector<16x256xf32>
    %6 = tpu.matmul %4, %5, %cst {dimension_numbers = #tpu.dot_dimension_numbers<[1], [0], [0], [1], [0, 0, 1, 1], [], []>} : vector<16x256xf32>, vector<256x256xf32>, vector<16x256xf32> -> vector<16x256xf32>
    %7 = arith.addf %3, %6 : vector<16x256xf32>
    %c0_6 = arith.constant 0 : index
    %c0_7 = arith.constant 0 : index
    %8 = vector.load %arg7[%c0_6, %c0_7] : memref<16x256xf32, #tpu.memory_space<vmem>>, vector<16x256xf32>
    tpu.vector_store %arg7[%c0_6, %c0_7], %7 {strides = array<i32>} : memref<16x256xf32, #tpu.memory_space<vmem>>, vector<16x256xf32>,
    %c0_i32_8 = arith.constant 0 : i32
    %9 = arith.cmpi eq, %arg2, %c0_i32_8 : i32
    %10 = arith.extui %9 : i1 to i32
    %c0_i32_9 = arith.constant 0 : i32
    %11 = arith.cmpi ne, %10, %c0_i32_9 : i32
    scf.if %11 {
      %c0_10 = arith.constant 0 : index
      %c0_11 = arith.constant 0 : index
      %12 = vector.load %arg7[%c0_10, %c0_11] : memref<16x256xf32, #tpu.memory_space<vmem>>, vector<16x256xf32>
      %c0_12 = arith.constant 0 : index
      %c0_13 = arith.constant 0 : index
      %13 = vector.load %arg5[%c0_12, %c0_13] : memref<1x256xf32, #tpu.memory_space<vmem>>, vector<1x256xf32>
      %14 = vector.broadcast %13 : vector<1x256xf32> to vector<16x256xf32>
      %15 = arith.addf %12, %14 : vector<16x256xf32>
      %c0_14 = arith.constant 0 : index
      %c0_15 = arith.constant 0 : index
      %16 = vector.load %arg6[%c0_14, %c0_15] : memref<16x256xf32, #tpu.memory_space<vmem>>, vector<16x256xf32>
      tpu.vector_store %arg6[%c0_14, %c0_15], %15 {strides = array<i32>} : memref<16x256xf32, #tpu.memory_space<vmem>>, vector<16x256xf32>,
    } else {
    }
    return
  }
  func.func @transform_0(%arg0: i32, %arg1: i32, %arg2: i32) -> (i32, i32) {
    %c0_i32 = arith.constant 0 : i32
    return %arg0, %arg2 : i32, i32
  }
  func.func @transform_1(%arg0: i32, %arg1: i32, %arg2: i32) -> (i32, i32) {
    %c0_i32 = arith.constant 0 : i32
    return %arg2, %arg1 : i32, i32
  }
  func.func @transform_2(%arg0: i32, %arg1: i32, %arg2: i32) -> (i32, i32) {
    %c0_i32 = arith.constant 0 : i32
    %c0_i32_0 = arith.constant 0 : i32
    return %c0_i32, %arg1 : i32, i32
  }
  func.func @transform_3(%arg0: i32, %arg1: i32, %arg2: i32) -> (i32, i32) {
    %c0_i32 = arith.constant 0 : i32
    return %arg0, %arg1 : i32, i32
  }
}

module attributes {stable_mosaic.version = 11 : i64} {
  func.func @_fc_res_ln_kernel(%arg0: i32, %arg1: i32, %arg2: memref<16x256xf32, #tpu.memory_space<vmem>>, %arg3: memref<256x256xf32, #tpu.memory_space<vmem>>, %arg4: memref<1x256xf32, #tpu.memory_space<vmem>>, %arg5: memref<16x256xf32, #tpu.memory_space<vmem>>, %arg6: memref<1x256xf32, #tpu.memory_space<vmem>>, %arg7: memref<1x256xf32, #tpu.memory_space<vmem>>, %arg8: memref<16x256xf32, #tpu.memory_space<vmem>>, %arg9: memref<16x256xf32, #tpu.memory_space<vmem>>) attributes {dimension_semantics = [#tpu.dimension_semantics<parallel>, #tpu.dimension_semantics<arbitrary>], iteration_bounds = array<i64: 1, 1>, scalar_prefetch = 0 : i64, scratch_operands = 1 : i64, tpu.core_type = #tpu.core_type<tc>, window_params = [{transform_indices = @transform_0, window_bounds = array<i64: 16, 256>}, {transform_indices = @transform_1, window_bounds = array<i64: 256, 256>}, {pipeline_mode = #tpu.pipeline_mode<synchronous>, transform_indices = @transform_2, window_bounds = array<i64: 1, 256>}, {transform_indices = @transform_3, window_bounds = array<i64: 16, 256>}, {pipeline_mode = #tpu.pipeline_mode<synchronous>, transform_indices = @transform_4, window_bounds = array<i64: 1, 256>}, {pipeline_mode = #tpu.pipeline_mode<synchronous>, transform_indices = @transform_5, window_bounds = array<i64: 1, 256>}, {transform_indices = @transform_6, window_bounds = array<i64: 16, 256>}]} {
    %c0_i32 = arith.constant 0 : i32
    %0 = arith.cmpi eq, %arg1, %c0_i32 : i32
    %1 = arith.extui %0 : i1 to i32
    %c0_i32_0 = arith.constant 0 : i32
    %2 = arith.cmpi ne, %1, %c0_i32_0 : i32
    scf.if %2 {
      %cst_10 = arith.constant 0.000000e+00 : f32
      %12 = vector.broadcast %cst_10 : f32 to vector<16x256xf32>
      %c0_11 = arith.constant 0 : index
      %c0_12 = arith.constant 0 : index
      %13 = vector.load %arg9[%c0_11, %c0_12] : memref<16x256xf32, #tpu.memory_space<vmem>>, vector<16x256xf32>
      tpu.vector_store %arg9[%c0_11, %c0_12], %12 {strides = array<i32>} : memref<16x256xf32, #tpu.memory_space<vmem>>, vector<16x256xf32>,
    } else {
    }
    %c0 = arith.constant 0 : index
    %c0_1 = arith.constant 0 : index
    %3 = vector.load %arg9[%c0, %c0_1] : memref<16x256xf32, #tpu.memory_space<vmem>>, vector<16x256xf32>
    %c0_2 = arith.constant 0 : index
    %c0_3 = arith.constant 0 : index
    %4 = vector.load %arg2[%c0_2, %c0_3] : memref<16x256xf32, #tpu.memory_space<vmem>>, vector<16x256xf32>
    %c0_4 = arith.constant 0 : index
    %c0_5 = arith.constant 0 : index
    %5 = vector.load %arg3[%c0_4, %c0_5] : memref<256x256xf32, #tpu.memory_space<vmem>>, vector<256x256xf32>
    %cst = arith.constant dense<0.000000e+00> : vector<16x256xf32>
    %6 = tpu.matmul %4, %5, %cst {dimension_numbers = #tpu.dot_dimension_numbers<[1], [0], [0], [1], [0, 0, 1, 1], [], []>} : vector<16x256xf32>, vector<256x256xf32>, vector<16x256xf32> -> vector<16x256xf32>
    %7 = arith.addf %3, %6 : vector<16x256xf32>
    %c0_6 = arith.constant 0 : index
    %c0_7 = arith.constant 0 : index
    %8 = vector.load %arg9[%c0_6, %c0_7] : memref<16x256xf32, #tpu.memory_space<vmem>>, vector<16x256xf32>
    tpu.vector_store %arg9[%c0_6, %c0_7], %7 {strides = array<i32>} : memref<16x256xf32, #tpu.memory_space<vmem>>, vector<16x256xf32>,
    %c0_i32_8 = arith.constant 0 : i32
    %9 = arith.cmpi eq, %arg1, %c0_i32_8 : i32
    %10 = arith.extui %9 : i1 to i32
    %c0_i32_9 = arith.constant 0 : i32
    %11 = arith.cmpi ne, %10, %c0_i32_9 : i32
    scf.if %11 {
      %c0_10 = arith.constant 0 : index
      %c0_11 = arith.constant 0 : index
      %12 = vector.load %arg9[%c0_10, %c0_11] : memref<16x256xf32, #tpu.memory_space<vmem>>, vector<16x256xf32>
      %c0_12 = arith.constant 0 : index
      %c0_13 = arith.constant 0 : index
      %13 = vector.load %arg4[%c0_12, %c0_13] : memref<1x256xf32, #tpu.memory_space<vmem>>, vector<1x256xf32>
      %14 = vector.broadcast %13 : vector<1x256xf32> to vector<16x256xf32>
      %15 = arith.addf %12, %14 : vector<16x256xf32>
      %c0_14 = arith.constant 0 : index
      %c0_15 = arith.constant 0 : index
      %16 = vector.load %arg5[%c0_14, %c0_15] : memref<16x256xf32, #tpu.memory_space<vmem>>, vector<16x256xf32>
      %17 = arith.addf %15, %16 : vector<16x256xf32>
      %cst_16 = arith.constant dense<0.000000e+00> : vector<16xf32>
      %18 = vector.multi_reduction <add>, %17, %cst_16 [1] : vector<16x256xf32> to vector<16xf32>
      %19 = vector.shape_cast %18 : vector<16xf32> to vector<16x1xf32>
      %cst_17 = arith.constant 2.560000e+02 : f32
      %20 = vector.broadcast %cst_17 : f32 to vector<16x1xf32>
      %21 = arith.divf %19, %20 : vector<16x1xf32>
      %22 = vector.broadcast %21 : vector<16x1xf32> to vector<16x256xf32>
      %23 = arith.subf %17, %22 : vector<16x256xf32>
      %24 = arith.mulf %23, %23 : vector<16x256xf32>
      %cst_18 = arith.constant dense<0.000000e+00> : vector<16xf32>
      %25 = vector.multi_reduction <add>, %24, %cst_18 [1] : vector<16x256xf32> to vector<16xf32>
      %26 = vector.shape_cast %25 : vector<16xf32> to vector<16x1xf32>
      %cst_19 = arith.constant 2.560000e+02 : f32
      %27 = vector.broadcast %cst_19 : f32 to vector<16x1xf32>
      %28 = arith.divf %26, %27 : vector<16x1xf32>
      %29 = vector.broadcast %21 : vector<16x1xf32> to vector<16x256xf32>
      %30 = arith.subf %17, %29 : vector<16x256xf32>
      %cst_20 = arith.constant 9.99999974E-6 : f32
      %31 = vector.broadcast %cst_20 : f32 to vector<16x1xf32>
      %32 = arith.addf %28, %31 : vector<16x1xf32>
      %33 = math.rsqrt %32 : vector<16x1xf32>
      %34 = vector.broadcast %33 : vector<16x1xf32> to vector<16x256xf32>
      %35 = arith.mulf %30, %34 : vector<16x256xf32>
      %c0_21 = arith.constant 0 : index
      %c0_22 = arith.constant 0 : index
      %36 = vector.load %arg6[%c0_21, %c0_22] : memref<1x256xf32, #tpu.memory_space<vmem>>, vector<1x256xf32>
      %37 = vector.broadcast %36 : vector<1x256xf32> to vector<16x256xf32>
      %38 = arith.mulf %35, %37 : vector<16x256xf32>
      %c0_23 = arith.constant 0 : index
      %c0_24 = arith.constant 0 : index
      %39 = vector.load %arg7[%c0_23, %c0_24] : memref<1x256xf32, #tpu.memory_space<vmem>>, vector<1x256xf32>
      %40 = vector.broadcast %39 : vector<1x256xf32> to vector<16x256xf32>
      %41 = arith.addf %38, %40 : vector<16x256xf32>
      %c0_25 = arith.constant 0 : index
      %c0_26 = arith.constant 0 : index
      %42 = vector.load %arg8[%c0_25, %c0_26] : memref<16x256xf32, #tpu.memory_space<vmem>>, vector<16x256xf32>
      tpu.vector_store %arg8[%c0_25, %c0_26], %41 {strides = array<i32>} : memref<16x256xf32, #tpu.memory_space<vmem>>, vector<16x256xf32>,
    } else {
    }
    return
  }
  func.func @transform_0(%arg0: i32, %arg1: i32) -> (i32, i32) {
    %c0_i32 = arith.constant 0 : i32
    return %arg0, %arg1 : i32, i32
  }
  func.func @transform_1(%arg0: i32, %arg1: i32) -> (i32, i32) {
    %c0_i32 = arith.constant 0 : i32
    %c0_i32_0 = arith.constant 0 : i32
    return %arg1, %c0_i32 : i32, i32
  }
  func.func @transform_2(%arg0: i32, %arg1: i32) -> (i32, i32) {
    %c0_i32 = arith.constant 0 : i32
    %c0_i32_0 = arith.constant 0 : i32
    %c0_i32_1 = arith.constant 0 : i32
    return %c0_i32, %c0_i32_0 : i32, i32
  }
  func.func @transform_3(%arg0: i32, %arg1: i32) -> (i32, i32) {
    %c0_i32 = arith.constant 0 : i32
    %c0_i32_0 = arith.constant 0 : i32
    return %arg0, %c0_i32 : i32, i32
  }
  func.func @transform_4(%arg0: i32, %arg1: i32) -> (i32, i32) {
    %c0_i32 = arith.constant 0 : i32
    %c0_i32_0 = arith.constant 0 : i32
    %c0_i32_1 = arith.constant 0 : i32
    return %c0_i32, %c0_i32_0 : i32, i32
  }
  func.func @transform_5(%arg0: i32, %arg1: i32) -> (i32, i32) {
    %c0_i32 = arith.constant 0 : i32
    %c0_i32_0 = arith.constant 0 : i32
    %c0_i32_1 = arith.constant 0 : i32
    return %c0_i32, %c0_i32_0 : i32, i32
  }
  func.func @transform_6(%arg0: i32, %arg1: i32) -> (i32, i32) {
    %c0_i32 = arith.constant 0 : i32
    %c0_i32_0 = arith.constant 0 : i32
    return %arg0, %c0_i32 : i32, i32
  }
}

</mosaic_0001>

<bundles_post_ra>
// kernel: multi_head_attention.6
= control target key start
LH: loop header
LB: loop body
LE: loop exit
PB: predicated region body
PF: predicated region fallthrough
CT: control target
= control target key end

     0   :  { %8 = vsyncpa [#allocation4], 0  ;;  %s458_s0 = inlined_call_operand.vmem [shape: f32[16,256], index: 0, kind: input, shape index: {}]   ;;  %s459_s1 = inlined_call_operand.hbm [shape: f32[256,256], index: 1, kind: input, shape index: {}]   ;;  %s460_s2 = inlined_call_operand.hbm [shape: f32[1,256], index: 2, kind: input, shape index: {}]   ;;  %s461_s3 = inlined_call_operand.vmem [shape: f32[16,256], index: 3, kind: output, shape index: {}]  }
   0x1   :  { %9 = vsyncpa [#allocation6], 0  ;;  %s386_s12 = smov [#allocation3]   ;;  %s338_s16 = scalar_lea.hbm %s459_s1, 8192 }
   0x2   :  { %s17_s13 = sshll.u32 %s386_s12, 4  ;;  %p339_p0 = scmp.ne.s32.totalorder %s459_s1, %s338_s16  ;;  %s18_s13 = int_to_ptr.vmem [resolvable:$true] %s17_s13 }
   0x3   :  { %p342_p1 = scmp.lt.u32.totalorder %s338_s16, %s459_s1 }
   0x5   :  { %p344_p2 = pnand %p342_p1, %p339_p0 }
   0x7   :  { %347 = shalt.err (!%p344_p2)
}
   0x8   :  { %s348_s21 = scalar_lea.vmem %s18_s13, 8192  ;;  %p353_p4 = scmp.lt.s32.totalorder %s18_s13, %s18_s13 }
   0x9   :  { %p349_p3 = scmp.ne.s32.totalorder %s18_s13, %s348_s21  ;;  %p354_p5 = scmp.lt.s32.totalorder %s348_s21, %s348_s21 }
   0xb   :  { %p355_p6 = por %p354_p5, %p353_p4 }
   0xd   :  { %p356_p7 = pnand %p355_p6, %p349_p3 }
   0xf   :  { %359 = shalt.err (!%p356_p7)
}
  0x10   :  { %s387_s22 = smov 256   ;;  %s388_s23 = smov 16  }
  0x11   :  { %23 = dma.hbm_to_vmem [thread:$0]  %s459_s1, 8192, %s18_s13, [#allocation4], %s387_s22, %s387_s22, %s388_s23  }
  0x12   :  { %s389_s26 = smov [#allocation5]   ;;  %s360_s30 = scalar_lea.hbm %s460_s2, 32 }
  0x13   :  { %s30_s27 = sshll.u32 %s389_s26, 4  ;;  %p361_p8 = scmp.ne.s32.totalorder %s460_s2, %s360_s30  ;;  %s31_s27 = int_to_ptr.vmem [resolvable:$true] %s30_s27 }
  0x14   :  { %p364_p9 = scmp.lt.u32.totalorder %s360_s30, %s460_s2 }
  0x16   :  { %p366_p10 = pnand %p364_p9, %p361_p8 }
  0x18   :  { %369 = shalt.err (!%p366_p10)
}
  0x19   :  { %s370_s8 = scalar_lea.vmem %s31_s27, 32  ;;  %p375_p12 = scmp.lt.s32.totalorder %s31_s27, %s31_s27 }
  0x1a   :  { %p371_p11 = scmp.ne.s32.totalorder %s31_s27, %s370_s8  ;;  %p376_p13 = scmp.lt.s32.totalorder %s370_s8, %s370_s8 }
  0x1c   :  { %p377_p0 = por %p376_p13, %p375_p12 }
  0x1e   :  { %p378_p1 = pnand %p377_p0, %p371_p11 }
  0x20   :  { %381 = shalt.err (!%p378_p1)
}
  0x21   :  { %33 = dma.hbm_to_vmem [thread:$0]  %s460_s2, 32, %s31_s27, [#allocation6]  }
  0x22   :  { %382 = dma.done.wait [#allocation4], 8192  }
  0x23   :  { %383 = vsyncadd [#allocation4], 4294959104 }
  0x24   :  { %384 = dma.done.wait [#allocation6], 32  }
  0x25   :  { %385 = vsyncadd [#allocation6], 4294967264  ;;  %v57_v0 = vld [vmem:[#allocation3 + $0x8] sm:$0xff]  ;;  %v59_v1 = vld [vmem:[#allocation3 + $0x18] sm:$0xff] }
  0x26   :  { %v56_v2 = vld [vmem:[#allocation3] sm:$0xff]  ;;  %v238_v3 = vpack.c.bf16 %v59_v1, %v57_v0  ;;  %v58_v4 = vld [vmem:[#allocation3 + $0x10] sm:$0xff]  ;;  %v61_v5 = vld [vmem:[#allocation3 + $0x28] sm:$0xff] }
  0x27   :  { %v63_v6 = vld [vmem:[#allocation3 + $0x38] sm:$0xff]  ;;  %v240_v7 = vpack.c.bf16 %v58_v4, %v56_v2  ;;  %v60_v9 = vld [vmem:[#allocation3 + $0x20] sm:$0xff]  ;;  %v62_v10 = vld [vmem:[#allocation3 + $0x30] sm:$0xff] }
  0x28   :  { %v242_v8 = vpack.c.bf16 %v63_v6, %v61_v5  ;;  %v65_v11 = vld [vmem:[#allocation3 + $0x48] sm:$0xff]  ;;  %239 = vmatprep.subr.bf16.mxu0 %v238_v3  ;;  %302 = vmatprep.subr.bf16.mxu1 %v238_v3  ;;  %v67_v12 = vld [vmem:[#allocation3 + $0x58] sm:$0xff]  ;;  %v244_v13 = vpack.c.bf16 %v62_v10, %v60_v9  ;;  %v64_v15 = vld [vmem:[#allocation3 + $0x40] sm:$0xff] }
  0x29   :  { %241 = vmatpush1.bf16.msra.mxu0 %v240_v7  ;;  %318 = vmatpush1.bf16.msra.mxu1 %v240_v7  ;;  %v246_v14 = vpack.c.bf16 %v67_v12, %v65_v11  ;;  %v66_v16 = vld [vmem:[#allocation3 + $0x50] sm:$0xff]  ;;  %v69_v17 = vld [vmem:[#allocation3 + $0x68] sm:$0xff]  ;;  %v71_v18 = vld [vmem:[#allocation3 + $0x78] sm:$0xff] }
  0x2a   :  { %243 = vmatprep.subr.bf16.mxu0 %v242_v8  ;;  %303 = vmatprep.subr.bf16.mxu1 %v242_v8  ;;  %v248_v19 = vpack.c.bf16 %v66_v16, %v64_v15  ;;  %v250_v20 = vpack.c.bf16 %v71_v18, %v69_v17  ;;  %v68_v21 = vld [vmem:[#allocation3 + $0x60] sm:$0xff]  ;;  %v70_v22 = vld [vmem:[#allocation3 + $0x70] sm:$0xff]  ;;  %v73_v23 = vld [vmem:[#allocation3 + $0x88] sm:$0xff] }
  0x2b   :  { %v75_v24 = vld [vmem:[#allocation3 + $0x98] sm:$0xff]  ;;  %v252_v25 = vpack.c.bf16 %v70_v22, %v68_v21  ;;  %v72_v27 = vld [vmem:[#allocation3 + $0x80] sm:$0xff]  ;;  %v74_v28 = vld [vmem:[#allocation3 + $0x90] sm:$0xff] }
  0x2c   :  { %v254_v26 = vpack.c.bf16 %v75_v24, %v73_v23  ;;  %v77_v29 = vld [vmem:[#allocation3 + $0xa8] sm:$0xff]  ;;  %v79_v30 = vld [vmem:[#allocation3 + $0xb8] sm:$0xff]  ;;  %v256_v31 = vpack.c.bf16 %v74_v28, %v72_v27  ;;  %v76_v33 = vld [vmem:[#allocation3 + $0xa0] sm:$0xff] }
  0x2d   :  { %245 = vmatpush1.bf16.msra.mxu0 %v244_v13  ;;  %319 = vmatpush1.bf16.msra.mxu1 %v244_v13  ;;  %v258_v32 = vpack.c.bf16 %v79_v30, %v77_v29  ;;  %v78_v34 = vld [vmem:[#allocation3 + $0xb0] sm:$0xff]  ;;  %v81_v35 = vld [vmem:[#allocation3 + $0xc8] sm:$0xff]  ;;  %v83_v36 = vld [vmem:[#allocation3 + $0xd8] sm:$0xff] }
  0x2e   :  { %247 = vmatprep.subr.bf16.mxu0 %v246_v14  ;;  %304 = vmatprep.subr.bf16.mxu1 %v246_v14  ;;  %v260_v37 = vpack.c.bf16 %v78_v34, %v76_v33  ;;  %v80_v38 = vld [vmem:[#allocation3 + $0xc0] sm:$0xff]  ;;  %v262_v39 = vpack.c.bf16 %v83_v36, %v81_v35  ;;  %v82_v40 = vld [vmem:[#allocation3 + $0xd0] sm:$0xff]  ;;  %v53_v41 = vld [vmem:[%s458_s0 + $0x8] sm:$0xff]  ;;  %v214_v36 = vlaneseq }
  0x2f   :  { %v55_v42 = vld [vmem:[%s458_s0 + $0x18] sm:$0xff]  ;;  %v85_v43 = vld [vmem:[#allocation3 + $0xe8] sm:$0xff]  ;;  %184 = vmatprep.mubr.f32.mxu0 %v53_v41  ;;  %v264_v45 = vpack.c.bf16 %v82_v40, %v80_v38  ;;  %v84_v47 = vld [vmem:[#allocation3 + $0xe0] sm:$0xff] }
  0x30   :  { %v87_v44 = vld [vmem:[#allocation3 + $0xf8] sm:$0xff]  ;;  %190 = vmatprep.mubr.f32.mxu1 %v55_v42  ;;  %v86_v48 = vld [vmem:[#allocation3 + $0xf0] sm:$0xff]  ;;  %v89_v49 = vld [vmem:[#allocation3 + $0x108] sm:$0xff] }
  0x31   :  { %249 = vmatpush1.bf16.msra.mxu0 %v248_v19  ;;  %320 = vmatpush1.bf16.msra.mxu1 %v248_v19  ;;  %v266_v46 = vpack.c.bf16 %v87_v44, %v85_v43  ;;  %v91_v50 = vld [vmem:[#allocation3 + $0x118] sm:$0xff]  ;;  %v268_v51 = vpack.c.bf16 %v86_v48, %v84_v47  ;;  %v88_v53 = vld [vmem:[#allocation3 + $0x100] sm:$0xff]  ;;  %v90_v54 = vld [vmem:[#allocation3 + $0x110] sm:$0xff] }
  0x32   :  { %251 = vmatprep.subr.bf16.mxu0 %v250_v20  ;;  %305 = vmatprep.subr.bf16.mxu1 %v250_v20  ;;  %v270_v52 = vpack.c.bf16 %v91_v50, %v89_v49  ;;  %v93_v55 = vld [vmem:[#allocation3 + $0x128] sm:$0xff]  ;;  %v95_v56 = vld [vmem:[#allocation3 + $0x138] sm:$0xff]  ;;  %v272_v57 = vpack.c.bf16 %v90_v54, %v88_v53  ;;  %v92_v59 = vld [vmem:[#allocation3 + $0x120] sm:$0xff] }
  0x33   :  { %v274_v58 = vpack.c.bf16 %v95_v56, %v93_v55  ;;  %v94_v60 = vld [vmem:[#allocation3 + $0x130] sm:$0xff]  ;;  %v97_v61 = vld [vmem:[#allocation3 + $0x148] sm:$0xff]  ;;  %v99_v62 = vld [vmem:[#allocation3 + $0x158] sm:$0xff] }
  0x34   :  { %v276_v63 = vpack.c.bf16 %v94_v60, %v92_v59  ;;  %v278_v0 = vpack.c.bf16 %v99_v62, %v97_v61  ;;  %v96_v1 = vld [vmem:[#allocation3 + $0x140] sm:$0xff]  ;;  %v98_v2 = vld [vmem:[#allocation3 + $0x150] sm:$0xff]  ;;  %v101_v3 = vld [vmem:[#allocation3 + $0x168] sm:$0xff] }
  0x35   :  { %253 = vmatpush1.bf16.msra.mxu0 %v252_v25  ;;  %321 = vmatpush1.bf16.msra.mxu1 %v252_v25  ;;  %v103_v4 = vld [vmem:[#allocation3 + $0x178] sm:$0xff]  ;;  %v280_v5 = vpack.c.bf16 %v98_v2, %v96_v1  ;;  %v100_v7 = vld [vmem:[#allocation3 + $0x160] sm:$0xff]  ;;  %v102_v8 = vld [vmem:[#allocation3 + $0x170] sm:$0xff] }
  0x36   :  { %255 = vmatprep.subr.bf16.mxu0 %v254_v26  ;;  %306 = vmatprep.subr.bf16.mxu1 %v254_v26  ;;  %v282_v6 = vpack.c.bf16 %v103_v4, %v101_v3  ;;  %v105_v9 = vld [vmem:[#allocation3 + $0x188] sm:$0xff]  ;;  %v107_v10 = vld [vmem:[#allocation3 + $0x198] sm:$0xff]  ;;  %v284_v11 = vpack.c.bf16 %v102_v8, %v100_v7  ;;  %v104_v13 = vld [vmem:[#allocation3 + $0x180] sm:$0xff] }
  0x37   :  { %v286_v12 = vpack.c.bf16 %v107_v10, %v105_v9  ;;  %v106_v14 = vld [vmem:[#allocation3 + $0x190] sm:$0xff]  ;;  %v109_v15 = vld [vmem:[#allocation3 + $0x1a8] sm:$0xff]  ;;  %v111_v16 = vld [vmem:[#allocation3 + $0x1b8] sm:$0xff] }
  0x38   :  { %v288_v17 = vpack.c.bf16 %v106_v14, %v104_v13  ;;  %v290_v18 = vpack.c.bf16 %v111_v16, %v109_v15  ;;  %v108_v19 = vld [vmem:[#allocation3 + $0x1a0] sm:$0xff]  ;;  %v110_v20 = vld [vmem:[#allocation3 + $0x1b0] sm:$0xff]  ;;  %v113_v21 = vld [vmem:[#allocation3 + $0x1c8] sm:$0xff] }
  0x39   :  { %257 = vmatpush1.bf16.msra.mxu0 %v256_v31  ;;  %322 = vmatpush1.bf16.msra.mxu1 %v256_v31  ;;  %v115_v22 = vld [vmem:[#allocation3 + $0x1d8] sm:$0xff]  ;;  %v292_v23 = vpack.c.bf16 %v110_v20, %v108_v19  ;;  %v112_v25 = vld [vmem:[#allocation3 + $0x1c0] sm:$0xff]  ;;  %v114_v26 = vld [vmem:[#allocation3 + $0x1d0] sm:$0xff] }
  0x3a   :  { %259 = vmatprep.subr.bf16.mxu0 %v258_v32  ;;  %307 = vmatprep.subr.bf16.mxu1 %v258_v32  ;;  %v294_v24 = vpack.c.bf16 %v115_v22, %v113_v21  ;;  %v117_v27 = vld [vmem:[#allocation3 + $0x1e8] sm:$0xff]  ;;  %v119_v28 = vld [vmem:[#allocation3 + $0x1f8] sm:$0xff]  ;;  %v296_v29 = vpack.c.bf16 %v114_v26, %v112_v25  ;;  %v116_v31 = vld [vmem:[#allocation3 + $0x1e0] sm:$0xff] }
  0x3b   :  { %v298_v30 = vpack.c.bf16 %v119_v28, %v117_v27  ;;  %v118_v32 = vld [vmem:[#allocation3 + $0x1f0] sm:$0xff]  ;;  %v52_v34 = vld [vmem:[%s458_s0] sm:$0xff] }
  0x3c   :  { %v300_v33 = vpack.c.bf16 %v118_v32, %v116_v31  ;;  %v54_v35 = vld [vmem:[%s458_s0 + $0x10] sm:$0xff] }
  0x3d   :  { %261 = vmatpush1.bf16.msra.mxu0 %v260_v37  ;;  %323 = vmatpush1.bf16.msra.mxu1 %v260_v37  ;;  %v215_v37 = vshrl.u32 %v214_v36, 7 }
  0x3e   :  { %263 = vmatprep.subr.bf16.mxu0 %v262_v39  ;;  %308 = vmatprep.subr.bf16.mxu1 %v262_v39  ;;  %v212_v39 = vld [vmem:[#allocation5] sm:$0x3] }
  0x3f   :  { %v216_v38 = vsub.s32 0, %v215_v37  ;;  %v220_v40 = vsub.s32 1, %v215_v37 }
  0x41   :  { %265 = vmatpush1.bf16.msra.mxu0 %v264_v45  ;;  %324 = vmatpush1.bf16.msra.mxu1 %v264_v45  ;;  %v217_v41 = vrot.slane %v212_v39, %v216_v38  ;;  %v221_v42 = vrot.slane %v212_v39, %v220_v40 }
  0x42   :  { %267 = vmatprep.subr.bf16.mxu0 %v266_v46  ;;  %309 = vmatprep.subr.bf16.mxu1 %v266_v46 }
  0x45   :  { %269 = vmatpush1.bf16.msra.mxu0 %v268_v51  ;;  %325 = vmatpush1.bf16.msra.mxu1 %v268_v51 }
  0x46   :  { %271 = vmatprep.subr.bf16.mxu0 %v270_v52  ;;  %310 = vmatprep.subr.bf16.mxu1 %v270_v52 }
  0x49   :  { %273 = vmatpush1.bf16.msra.mxu0 %v272_v57  ;;  %326 = vmatpush1.bf16.msra.mxu1 %v272_v57 }
  0x4a   :  { %275 = vmatprep.subr.bf16.mxu0 %v274_v58  ;;  %311 = vmatprep.subr.bf16.mxu1 %v274_v58 }
  0x4d   :  { %277 = vmatpush1.bf16.msra.mxu0 %v276_v63  ;;  %327 = vmatpush1.bf16.msra.mxu1 %v276_v63 }
  0x4e   :  { %279 = vmatprep.subr.bf16.mxu0 %v278_v0  ;;  %312 = vmatprep.subr.bf16.mxu1 %v278_v0 }
  0x51   :  { %281 = vmatpush1.bf16.msra.mxu0 %v280_v5  ;;  %328 = vmatpush1.bf16.msra.mxu1 %v280_v5 }
  0x52   :  { %283 = vmatprep.subr.bf16.mxu0 %v282_v6  ;;  %313 = vmatprep.subr.bf16.mxu1 %v282_v6 }
  0x55   :  { %285 = vmatpush1.bf16.msra.mxu0 %v284_v11  ;;  %329 = vmatpush1.bf16.msra.mxu1 %v284_v11 }
  0x56   :  { %287 = vmatprep.subr.bf16.mxu0 %v286_v12  ;;  %314 = vmatprep.subr.bf16.mxu1 %v286_v12 }
  0x59   :  { %289 = vmatpush1.bf16.msra.mxu0 %v288_v17  ;;  %330 = vmatpush1.bf16.msra.mxu1 %v288_v17 }
  0x5a   :  { %291 = vmatprep.subr.bf16.mxu0 %v290_v18  ;;  %315 = vmatprep.subr.bf16.mxu1 %v290_v18 }
  0x5d   :  { %293 = vmatpush1.bf16.msra.mxu0 %v292_v23  ;;  %331 = vmatpush1.bf16.msra.mxu1 %v292_v23 }
  0x5e   :  { %295 = vmatprep.subr.bf16.mxu0 %v294_v24  ;;  %316 = vmatprep.subr.bf16.mxu1 %v294_v24 }
  0x61   :  { %297 = vmatpush1.bf16.msra.mxu0 %v296_v29  ;;  %332 = vmatpush1.bf16.msra.mxu1 %v296_v29 }
  0x62   :  { %299 = vmatprep.subr.bf16.mxu0 %v298_v30  ;;  %317 = vmatprep.subr.bf16.mxu1 %v298_v30 }
  0x65   :  { %301 = vmatpush1.bf16.msra.mxu0 %v300_v33  ;;  %333 = vmatpush1.bf16.msra.mxu1 %v300_v33 }
  0x68   :  { %185 = vmatmul.mubr.f32.vlgmr.msra.gmra.mrb[0].mxu0 %v52_v34  ;;  %191 = vmatmul.mubr.f32.vlgmr.msra.gmra.mrb[0].mxu1 %v54_v35 }
 0x13b   :  { %v186_v43 = vpop.f32.mrb[0].mxu0  ;;  %v192_v44 = vpop.f32.mrb[0].mxu1 }
 0x13c   :  { %v224_v45 = vadd.f32 %v217_v41, %v186_v43  ;;  %v226_v46 = vadd.f32 %v217_v41, %v192_v44  ;;  %v188_v47 = vpop.f32.mrb[1].mxu0  ;;  %v194_v48 = vpop.f32.mrb[1].mxu1 }
 0x13d   :  { %v225_v49 = vadd.f32 %v221_v42, %v188_v47  ;;  %v227_v50 = vadd.f32 %v221_v42, %v194_v48 }
 0x13e   :  { %228 = vst [vmem:[%s461_s3] sm:$0xff] %v224_v45  ;;  %230 = vst [vmem:[%s461_s3 + $0x10] sm:$0xff] %v226_v46 }
 0x13f   :  { %229 = vst [vmem:[%s461_s3 + $0x8] sm:$0xff] %v225_v49  ;;  %231 = vst [vmem:[%s461_s3 + $0x18] sm:$0xff] %v227_v50 }
 0x140   :  { %236 = vsyncpa [#allocation4], 1 }
 0x141   :  { %237 = vsyncpa [#allocation6], 1 }

// kernel: multi_head_attention.5
= control target key start
LH: loop header
LB: loop body
LE: loop exit
PB: predicated region body
PF: predicated region fallthrough
CT: control target
= control target key end

     0   :  { %s545_s1 = inlined_call_operand.vmem [shape: f32[256,256], index: 1, kind: input, shape index: {}]   ;;  %s546_s0 = inlined_call_operand.vmem [shape: f32[16,256], index: 0, kind: input, shape index: {}]   ;;  %s547_s2 = inlined_call_operand.vmem [shape: f32[1,256], index: 2, kind: input, shape index: {}]   ;;  %s548_s3 = inlined_call_operand.vmem [shape: f32[16,256], index: 3, kind: output, shape index: {}]  }
   0x1   :  { %v31_v0 = vld [vmem:[%s545_s1 + $0x8] sm:$0xff]  ;;  %v33_v1 = vld [vmem:[%s545_s1 + $0x18] sm:$0xff]  ;;  %v30_v2 = vld [vmem:[%s545_s1] sm:$0xff] }
   0x2   :  { %v210_v3 = vpack.c.bf16 %v33_v1, %v31_v0  ;;  %v32_v4 = vld [vmem:[%s545_s1 + $0x10] sm:$0xff]  ;;  %v35_v5 = vld [vmem:[%s545_s1 + $0x28] sm:$0xff]  ;;  %v37_v6 = vld [vmem:[%s545_s1 + $0x38] sm:$0xff] }
   0x3   :  { %v212_v7 = vpack.c.bf16 %v32_v4, %v30_v2  ;;  %v214_v8 = vpack.c.bf16 %v37_v6, %v35_v5  ;;  %v34_v9 = vld [vmem:[%s545_s1 + $0x20] sm:$0xff]  ;;  %v36_v10 = vld [vmem:[%s545_s1 + $0x30] sm:$0xff]  ;;  %v39_v11 = vld [vmem:[%s545_s1 + $0x48] sm:$0xff] }
   0x4   :  { %211 = vmatprep.subr.bf16.mxu0 %v210_v3  ;;  %274 = vmatprep.subr.bf16.mxu1 %v210_v3  ;;  %v41_v12 = vld [vmem:[%s545_s1 + $0x58] sm:$0xff]  ;;  %v216_v13 = vpack.c.bf16 %v36_v10, %v34_v9  ;;  %v38_v15 = vld [vmem:[%s545_s1 + $0x40] sm:$0xff]  ;;  %v40_v16 = vld [vmem:[%s545_s1 + $0x50] sm:$0xff] }
   0x5   :  { %213 = vmatpush1.bf16.msra.mxu0 %v212_v7  ;;  %290 = vmatpush1.bf16.msra.mxu1 %v212_v7  ;;  %v218_v14 = vpack.c.bf16 %v41_v12, %v39_v11  ;;  %v43_v17 = vld [vmem:[%s545_s1 + $0x68] sm:$0xff]  ;;  %v45_v18 = vld [vmem:[%s545_s1 + $0x78] sm:$0xff]  ;;  %v220_v19 = vpack.c.bf16 %v40_v16, %v38_v15  ;;  %v42_v21 = vld [vmem:[%s545_s1 + $0x60] sm:$0xff] }
   0x6   :  { %215 = vmatprep.subr.bf16.mxu0 %v214_v8  ;;  %275 = vmatprep.subr.bf16.mxu1 %v214_v8  ;;  %v222_v20 = vpack.c.bf16 %v45_v18, %v43_v17  ;;  %v44_v22 = vld [vmem:[%s545_s1 + $0x70] sm:$0xff]  ;;  %v47_v23 = vld [vmem:[%s545_s1 + $0x88] sm:$0xff]  ;;  %v49_v24 = vld [vmem:[%s545_s1 + $0x98] sm:$0xff] }
   0x7   :  { %v224_v25 = vpack.c.bf16 %v44_v22, %v42_v21  ;;  %v226_v26 = vpack.c.bf16 %v49_v24, %v47_v23  ;;  %v46_v27 = vld [vmem:[%s545_s1 + $0x80] sm:$0xff]  ;;  %v48_v28 = vld [vmem:[%s545_s1 + $0x90] sm:$0xff]  ;;  %v51_v29 = vld [vmem:[%s545_s1 + $0xa8] sm:$0xff] }
   0x8   :  { %v53_v30 = vld [vmem:[%s545_s1 + $0xb8] sm:$0xff]  ;;  %v228_v31 = vpack.c.bf16 %v48_v28, %v46_v27  ;;  %v50_v33 = vld [vmem:[%s545_s1 + $0xa0] sm:$0xff]  ;;  %v52_v34 = vld [vmem:[%s545_s1 + $0xb0] sm:$0xff] }
   0x9   :  { %217 = vmatpush1.bf16.msra.mxu0 %v216_v13  ;;  %291 = vmatpush1.bf16.msra.mxu1 %v216_v13  ;;  %v230_v32 = vpack.c.bf16 %v53_v30, %v51_v29  ;;  %v55_v35 = vld [vmem:[%s545_s1 + $0xc8] sm:$0xff]  ;;  %v57_v36 = vld [vmem:[%s545_s1 + $0xd8] sm:$0xff]  ;;  %v232_v37 = vpack.c.bf16 %v52_v34, %v50_v33  ;;  %v54_v38 = vld [vmem:[%s545_s1 + $0xc0] sm:$0xff] }
   0xa   :  { %219 = vmatprep.subr.bf16.mxu0 %v218_v14  ;;  %276 = vmatprep.subr.bf16.mxu1 %v218_v14  ;;  %v234_v39 = vpack.c.bf16 %v57_v36, %v55_v35  ;;  %v56_v40 = vld [vmem:[%s545_s1 + $0xd0] sm:$0xff]  ;;  %v27_v41 = vld [vmem:[%s546_s0 + $0x8] sm:$0xff]  ;;  %v29_v42 = vld [vmem:[%s546_s0 + $0x18] sm:$0xff]  ;;  %v188_v36 = vlaneseq }
   0xb   :  { %v59_v43 = vld [vmem:[%s545_s1 + $0xe8] sm:$0xff]  ;;  %v61_v44 = vld [vmem:[%s545_s1 + $0xf8] sm:$0xff]  ;;  %158 = vmatprep.mubr.f32.mxu0 %v27_v41  ;;  %164 = vmatprep.mubr.f32.mxu1 %v29_v42  ;;  %v236_v45 = vpack.c.bf16 %v56_v40, %v54_v38  ;;  %v58_v47 = vld [vmem:[%s545_s1 + $0xe0] sm:$0xff] }
   0xc   :  { %v238_v46 = vpack.c.bf16 %v61_v44, %v59_v43  ;;  %v60_v48 = vld [vmem:[%s545_s1 + $0xf0] sm:$0xff]  ;;  %v63_v49 = vld [vmem:[%s545_s1 + $0x108] sm:$0xff]  ;;  %v65_v50 = vld [vmem:[%s545_s1 + $0x118] sm:$0xff] }
   0xd   :  { %221 = vmatpush1.bf16.msra.mxu0 %v220_v19  ;;  %292 = vmatpush1.bf16.msra.mxu1 %v220_v19  ;;  %v240_v51 = vpack.c.bf16 %v60_v48, %v58_v47  ;;  %v242_v52 = vpack.c.bf16 %v65_v50, %v63_v49  ;;  %v62_v53 = vld [vmem:[%s545_s1 + $0x100] sm:$0xff]  ;;  %v64_v54 = vld [vmem:[%s545_s1 + $0x110] sm:$0xff]  ;;  %v67_v55 = vld [vmem:[%s545_s1 + $0x128] sm:$0xff] }
   0xe   :  { %223 = vmatprep.subr.bf16.mxu0 %v222_v20  ;;  %277 = vmatprep.subr.bf16.mxu1 %v222_v20  ;;  %v69_v56 = vld [vmem:[%s545_s1 + $0x138] sm:$0xff]  ;;  %v244_v57 = vpack.c.bf16 %v64_v54, %v62_v53  ;;  %v66_v59 = vld [vmem:[%s545_s1 + $0x120] sm:$0xff]  ;;  %v68_v60 = vld [vmem:[%s545_s1 + $0x130] sm:$0xff] }
   0xf   :  { %v246_v58 = vpack.c.bf16 %v69_v56, %v67_v55  ;;  %v71_v61 = vld [vmem:[%s545_s1 + $0x148] sm:$0xff]  ;;  %v73_v62 = vld [vmem:[%s545_s1 + $0x158] sm:$0xff]  ;;  %v248_v63 = vpack.c.bf16 %v68_v60, %v66_v59  ;;  %v70_v1 = vld [vmem:[%s545_s1 + $0x140] sm:$0xff] }
  0x10   :  { %v250_v0 = vpack.c.bf16 %v73_v62, %v71_v61  ;;  %v72_v2 = vld [vmem:[%s545_s1 + $0x150] sm:$0xff]  ;;  %v75_v3 = vld [vmem:[%s545_s1 + $0x168] sm:$0xff]  ;;  %v77_v4 = vld [vmem:[%s545_s1 + $0x178] sm:$0xff] }
  0x11   :  { %225 = vmatpush1.bf16.msra.mxu0 %v224_v25  ;;  %293 = vmatpush1.bf16.msra.mxu1 %v224_v25  ;;  %v252_v5 = vpack.c.bf16 %v72_v2, %v70_v1  ;;  %v254_v6 = vpack.c.bf16 %v77_v4, %v75_v3  ;;  %v74_v7 = vld [vmem:[%s545_s1 + $0x160] sm:$0xff]  ;;  %v76_v8 = vld [vmem:[%s545_s1 + $0x170] sm:$0xff]  ;;  %v79_v9 = vld [vmem:[%s545_s1 + $0x188] sm:$0xff] }
  0x12   :  { %227 = vmatprep.subr.bf16.mxu0 %v226_v26  ;;  %278 = vmatprep.subr.bf16.mxu1 %v226_v26  ;;  %v81_v10 = vld [vmem:[%s545_s1 + $0x198] sm:$0xff]  ;;  %v256_v11 = vpack.c.bf16 %v76_v8, %v74_v7  ;;  %v78_v13 = vld [vmem:[%s545_s1 + $0x180] sm:$0xff]  ;;  %v80_v14 = vld [vmem:[%s545_s1 + $0x190] sm:$0xff] }
  0x13   :  { %v258_v12 = vpack.c.bf16 %v81_v10, %v79_v9  ;;  %v83_v15 = vld [vmem:[%s545_s1 + $0x1a8] sm:$0xff]  ;;  %v85_v16 = vld [vmem:[%s545_s1 + $0x1b8] sm:$0xff]  ;;  %v260_v17 = vpack.c.bf16 %v80_v14, %v78_v13  ;;  %v82_v19 = vld [vmem:[%s545_s1 + $0x1a0] sm:$0xff] }
  0x14   :  { %v262_v18 = vpack.c.bf16 %v85_v16, %v83_v15  ;;  %v84_v20 = vld [vmem:[%s545_s1 + $0x1b0] sm:$0xff]  ;;  %v87_v21 = vld [vmem:[%s545_s1 + $0x1c8] sm:$0xff]  ;;  %v89_v22 = vld [vmem:[%s545_s1 + $0x1d8] sm:$0xff] }
  0x15   :  { %229 = vmatpush1.bf16.msra.mxu0 %v228_v31  ;;  %294 = vmatpush1.bf16.msra.mxu1 %v228_v31  ;;  %v264_v23 = vpack.c.bf16 %v84_v20, %v82_v19  ;;  %v266_v24 = vpack.c.bf16 %v89_v22, %v87_v21  ;;  %v86_v25 = vld [vmem:[%s545_s1 + $0x1c0] sm:$0xff]  ;;  %v88_v26 = vld [vmem:[%s545_s1 + $0x1d0] sm:$0xff]  ;;  %v91_v27 = vld [vmem:[%s545_s1 + $0x1e8] sm:$0xff] }
  0x16   :  { %231 = vmatprep.subr.bf16.mxu0 %v230_v32  ;;  %279 = vmatprep.subr.bf16.mxu1 %v230_v32  ;;  %v93_v28 = vld [vmem:[%s545_s1 + $0x1f8] sm:$0xff]  ;;  %v268_v29 = vpack.c.bf16 %v88_v26, %v86_v25  ;;  %v90_v31 = vld [vmem:[%s545_s1 + $0x1e0] sm:$0xff]  ;;  %v92_v32 = vld [vmem:[%s545_s1 + $0x1f0] sm:$0xff] }
  0x17   :  { %v270_v30 = vpack.c.bf16 %v93_v28, %v91_v27  ;;  %v272_v33 = vpack.c.bf16 %v92_v32, %v90_v31  ;;  %v26_v34 = vld [vmem:[%s546_s0] sm:$0xff]  ;;  %v28_v35 = vld [vmem:[%s546_s0 + $0x10] sm:$0xff] }
  0x19   :  { %233 = vmatpush1.bf16.msra.mxu0 %v232_v37  ;;  %295 = vmatpush1.bf16.msra.mxu1 %v232_v37  ;;  %v189_v37 = vshrl.u32 %v188_v36, 7 }
  0x1a   :  { %235 = vmatprep.subr.bf16.mxu0 %v234_v39  ;;  %280 = vmatprep.subr.bf16.mxu1 %v234_v39  ;;  %v186_v39 = vld [vmem:[%s547_s2] sm:$0x3] }
  0x1b   :  { %v190_v38 = vsub.s32 0, %v189_v37  ;;  %v194_v40 = vsub.s32 1, %v189_v37 }
  0x1d   :  { %237 = vmatpush1.bf16.msra.mxu0 %v236_v45  ;;  %296 = vmatpush1.bf16.msra.mxu1 %v236_v45  ;;  %v191_v41 = vrot.slane %v186_v39, %v190_v38  ;;  %v195_v42 = vrot.slane %v186_v39, %v194_v40 }
  0x1e   :  { %239 = vmatprep.subr.bf16.mxu0 %v238_v46  ;;  %281 = vmatprep.subr.bf16.mxu1 %v238_v46 }
  0x21   :  { %241 = vmatpush1.bf16.msra.mxu0 %v240_v51  ;;  %297 = vmatpush1.bf16.msra.mxu1 %v240_v51 }
  0x22   :  { %243 = vmatprep.subr.bf16.mxu0 %v242_v52  ;;  %282 = vmatprep.subr.bf16.mxu1 %v242_v52 }
  0x25   :  { %245 = vmatpush1.bf16.msra.mxu0 %v244_v57  ;;  %298 = vmatpush1.bf16.msra.mxu1 %v244_v57 }
  0x26   :  { %247 = vmatprep.subr.bf16.mxu0 %v246_v58  ;;  %283 = vmatprep.subr.bf16.mxu1 %v246_v58 }
  0x29   :  { %249 = vmatpush1.bf16.msra.mxu0 %v248_v63  ;;  %299 = vmatpush1.bf16.msra.mxu1 %v248_v63 }
  0x2a   :  { %251 = vmatprep.subr.bf16.mxu0 %v250_v0  ;;  %284 = vmatprep.subr.bf16.mxu1 %v250_v0 }
  0x2d   :  { %253 = vmatpush1.bf16.msra.mxu0 %v252_v5  ;;  %300 = vmatpush1.bf16.msra.mxu1 %v252_v5 }
  0x2e   :  { %255 = vmatprep.subr.bf16.mxu0 %v254_v6  ;;  %285 = vmatprep.subr.bf16.mxu1 %v254_v6 }
  0x31   :  { %257 = vmatpush1.bf16.msra.mxu0 %v256_v11  ;;  %301 = vmatpush1.bf16.msra.mxu1 %v256_v11 }
  0x32   :  { %259 = vmatprep.subr.bf16.mxu0 %v258_v12  ;;  %286 = vmatprep.subr.bf16.mxu1 %v258_v12 }
  0x35   :  { %261 = vmatpush1.bf16.msra.mxu0 %v260_v17  ;;  %302 = vmatpush1.bf16.msra.mxu1 %v260_v17 }
  0x36   :  { %263 = vmatprep.subr.bf16.mxu0 %v262_v18  ;;  %287 = vmatprep.subr.bf16.mxu1 %v262_v18 }
  0x39   :  { %265 = vmatpush1.bf16.msra.mxu0 %v264_v23  ;;  %303 = vmatpush1.bf16.msra.mxu1 %v264_v23 }
  0x3a   :  { %267 = vmatprep.subr.bf16.mxu0 %v266_v24  ;;  %288 = vmatprep.subr.bf16.mxu1 %v266_v24 }
  0x3d   :  { %269 = vmatpush1.bf16.msra.mxu0 %v268_v29  ;;  %304 = vmatpush1.bf16.msra.mxu1 %v268_v29 }
  0x3e   :  { %271 = vmatprep.subr.bf16.mxu0 %v270_v30  ;;  %289 = vmatprep.subr.bf16.mxu1 %v270_v30 }
  0x41   :  { %273 = vmatpush1.bf16.msra.mxu0 %v272_v33  ;;  %305 = vmatpush1.bf16.msra.mxu1 %v272_v33 }
  0x44   :  { %159 = vmatmul.mubr.f32.vlgmr.msra.gmra.mrb[0].mxu0 %v26_v34  ;;  %165 = vmatmul.mubr.f32.vlgmr.msra.gmra.mrb[0].mxu1 %v28_v35 }
 0x117   :  { %v160_v43 = vpop.f32.mrb[0].mxu0  ;;  %v166_v44 = vpop.f32.mrb[0].mxu1 }
 0x118   :  { %v198_v45 = vadd.f32 %v191_v41, %v160_v43  ;;  %v200_v46 = vadd.f32 %v191_v41, %v166_v44  ;;  %v162_v47 = vpop.f32.mrb[1].mxu0  ;;  %v168_v48 = vpop.f32.mrb[1].mxu1 }
 0x119   :  { %v199_v49 = vadd.f32 %v195_v42, %v162_v47  ;;  %v201_v50 = vadd.f32 %v195_v42, %v168_v48 }
 0x11a   :  { %202 = vst [vmem:[%s548_s3] sm:$0xff] %v198_v45  ;;  %204 = vst [vmem:[%s548_s3 + $0x10] sm:$0xff] %v200_v46 }
 0x11b   :  { %203 = vst [vmem:[%s548_s3 + $0x8] sm:$0xff] %v199_v49  ;;  %205 = vst [vmem:[%s548_s3 + $0x18] sm:$0xff] %v201_v50 }

// kernel: multi_head_attention.8
= control target key start
LH: loop header
LB: loop body
LE: loop exit
PB: predicated region body
PF: predicated region fallthrough
CT: control target
= control target key end

     0   :  { %11 = vsyncpa [#allocation7], 0  ;;  %s1409_s0 = inlined_call_operand.vmem [shape: f32[2,8,256], index: 0, kind: input, shape index: {}]   ;;  %s1410_s1 = inlined_call_operand.vmem [shape: f32[2,8,256], index: 1, kind: input, shape index: {}]   ;;  %s1411_s2 = inlined_call_operand.vmem [shape: f32[2,8,256], index: 2, kind: input, shape index: {}]   ;;  %s1412_s3 = inlined_call_operand.vmem [shape: s32[2,8,8], index: 3, kind: input, shape index: {}]   ;;  %s1413_s4 = inlined_call_operand.vmem [shape: f32[2,8,256], index: 4, kind: output, shape index: {0}]   ;;  %s1414_s5 = inlined_call_operand.hbm [shape: f32[4,8,8], index: 5, kind: output, shape index: {1}]  }
   0x1   :  { %13 = vsyncpa [#allocation7 + $0x1], 0  ;;  %s1234_s18 = smov 0   ;;  %s1236_s19 = smov 0  }
   0x2   :  { %s1238_s20 = smov 0   ;;  %s1240_s21 = smov 0  }
   0x3   :  { %s1242_s22 = smov 0   ;;  %s1244_s23 = smov 0  }
   0x4 LB: > { %s997_s24 = sadd.s32 4294967295, %s1197_s23   ;;  %s998_s25 = sadd.s32 4294967294, %s1197_s23   ;;  %s1197_s23 = sphi %s1244_s23, %s19_s23   ;;  %s1193_s22 = sphi %s1242_s22, %s1422_s22   ;;  %s1189_s21 = sphi %s1240_s21, %s1421_s21   ;;  %s1185_s20 = sphi %s1238_s20, %s1420_s20   ;;  %s1181_s19 = sphi %s1236_s19, %s1419_s19   ;;  %s1177_s18 = sphi %s1234_s18, %s1418_s18  }
   0x5   : > { %s28_s26 = sadd.s32 1, %s1193_s22  ;;  %s40_s27 = sadd.s32 1, %s1185_s20 }
   0x6   : > { %p29_p0 = scmp.ge.s32.totalorder %s28_s26, 2  ;;  %p47_p1 = scmp.ne.s32.totalorder %s1185_s20, %s1181_s19 }
   0x7   : > { %p48_p2 = scmp.eq.s32.totalorder %s1197_s23, 0  ;;  %p161_p3 = scmp.eq.s32.totalorder %s997_s24, 1 }
   0x8   : > { %s1424_s26 = smov (%p29_p0, %s28_s26), 0  ;;  %p194_p6 = scmp.ne.s32.totalorder %s1181_s19, %s1177_s18 }
   0x9   : > { %p1273_p4 = por %p48_p2, %p47_p1  ;;  %p1277_p5 = por %p161_p3, %p47_p1 }
   0xa   : > { %s36_s30 = ssub.s32 %s1193_s22, %s1424_s26  ;;  %p195_p8 = scmp.eq.s32.totalorder %s998_s25, 1 }
   0xb   : > { %p38_p7 = scmp.eq.s32.totalorder %s36_s30, 0  ;;  %p1001_p10 = scmp.ge.s32.totalorder %s1197_s23, 2 }
   0xc   : > { %p1288_p9 = por %p195_p8, %p194_p6 }
   0xd   : > { %s1286_s6 = scalar_select %p38_p7, %s1185_s20, %s40_s27  }
   0xe   : > { %220 = sbr.rel (%p1001_p10) target bundleno = 42 (0x2a), region = 20 }
  0x15   : > { %223 = sbr.rel (!%p1273_p4) target bundleno = 28 (0x1c), region = 24  ;;  %s225_s8 = sand.u32 (%p1273_p4), 1, %s1185_s20  }
  0x16   : > { %s1003_s9 = sshll.u32 (%p1273_p4), %s1193_s22, 3  ;;  %s1002_s10 = sshll.u32 (%p1273_p4), %s225_s8, 4 }
  0x17   : > { %s232_s13 = scalar_lea.vmem (%p1273_p4), %s1409_s0, %s1003_s9  ;;  %s227_s14 = scalar_lea.vmem (%p1273_p4), [#allocation2], %s1002_s10 }
  0x18   : > { %v262_v0 = vld [vmem:[%s232_s13] sm:$0xff] (%p1273_p4)  ;;  %v264_v1 = vld [vmem:[%s232_s13 + $0x10] sm:$0xff] (%p1273_p4) }
  0x19   : > { %263 = vst [vmem:[%s227_s14] sm:$0xff] (%p1273_p4), %v262_v0  ;;  %265 = vst [vmem:[%s227_s14 + $0x8] sm:$0xff] (%p1273_p4), %v264_v1 }
  0x1c PF: > { %271 = sbr.rel (!%p1273_p4) target bundleno = 35 (0x23), region = 62  ;;  %s273_s15 = sand.u32 (%p1273_p4), 1, %s1185_s20  }
  0x1d   : > { %s1005_s16 = sshll.u32 (%p1273_p4), %s1193_s22, 3  ;;  %s1004_s17 = sshll.u32 (%p1273_p4), %s273_s15, 4 }
  0x1e   : > { %s280_s27 = scalar_lea.vmem (%p1273_p4), %s1410_s1, %s1005_s16  ;;  %s275_s30 = scalar_lea.vmem (%p1273_p4), [#allocation3], %s1004_s17 }
  0x1f   : > { %v310_v2 = vld [vmem:[%s280_s27] sm:$0xff] (%p1273_p4)  ;;  %v312_v3 = vld [vmem:[%s280_s27 + $0x10] sm:$0xff] (%p1273_p4) }
  0x20   : > { %311 = vst [vmem:[%s275_s30] sm:$0xff] (%p1273_p4), %v310_v2  ;;  %313 = vst [vmem:[%s275_s30 + $0x8] sm:$0xff] (%p1273_p4), %v312_v3 }
  0x23 PF: > { %319 = sbr.rel (!%p1273_p4) target bundleno = 42 (0x2a), region = 100  ;;  %s321_s8 = sand.u32 (%p1273_p4), 1, %s1185_s20  }
  0x24   : > { %s1007_s9 = sshll.u32 (%p1273_p4), %s1193_s22, 3  ;;  %s1006_s10 = sshll.u32 (%p1273_p4), %s321_s8, 4 }
  0x25   : > { %s328_s13 = scalar_lea.vmem (%p1273_p4), %s1411_s2, %s1007_s9  ;;  %s323_s14 = scalar_lea.vmem (%p1273_p4), [#allocation4], %s1006_s10 }
  0x26   : > { %v358_v4 = vld [vmem:[%s328_s13] sm:$0xff] (%p1273_p4)  ;;  %v360_v5 = vld [vmem:[%s328_s13 + $0x10] sm:$0xff] (%p1273_p4) }
  0x27   : > { %359 = vst [vmem:[%s323_s14] sm:$0xff] (%p1273_p4), %v358_v4  ;;  %361 = vst [vmem:[%s323_s14 + $0x8] sm:$0xff] (%p1273_p4), %v360_v5 }
  0x2a PF: > { %p1008_p11 = scmp.ge.s32.totalorder %s1197_s23, 1  ;;  %p366_p12 = scmp.lt.s32.totalorder %s1197_s23, 3 }
  0x2c   : > { %p367_p13 = pnand %p1008_p11, %p366_p12 }
  0x2d   : > { %s373_s28 = sand.u32 (!%p367_p13), 1, %s1181_s19   ;;  %v1199_v6 = vmov (!%p367_p13), 0.0   ;;  %vm1200_vm0 = vmmov (!%p367_p13), 0   ;;  %v591_v13 = vld [vmem:[%s1412_s3] sm:$0xff] (!%p367_p13)  ;;  %v592_v14 = vld [vmem:[%s1412_s3 + $0x8] sm:$0xff] (!%p367_p13)  ;;  %vm597_vm3 = vcmask (!%p367_p13), 64512  }
  0x2e   : > { %370 = sbr.rel (%p367_p13) target bundleno = 829 (0x33d), region = 138  ;;  %1032 = vmatprep.subr.mxu0 (!%p367_p13), %v1199_v6  ;;  %s1321_s15 = sshll.u32 (!%p367_p13), %s373_s28, 4  ;;  %1034 = vmatprep.mubr.msk.f32.mxu0 (!%p367_p13), %vm1200_vm0, %v1199_v6  ;;  %vm593_vm1 = vcmp.ne.s32.totalorder (!%p367_p13), %v591_v13, 0  ;;  %vm594_vm2 = vcmp.ne.s32.totalorder (!%p367_p13), %v592_v14, 0 }
  0x2f   : > { %1037 = vmatprep.subr.mxu1 (!%p367_p13), %v1199_v6  ;;  %1039 = vmatprep.mubr.msk.f32.mxu1 (!%p367_p13), %vm1200_vm0, %v1199_v6  ;;  %s382_s16 = scalar_lea.vmem (!%p367_p13), [#allocation3], %s1321_s15  ;;  %s375_s17 = scalar_lea.vmem (!%p367_p13), [#allocation2], %s1321_s15 }
  0x30   : > { %v447_v7 = vld [vmem:[%s382_s16] sm:$0xff] (!%p367_p13)  ;;  %v448_v8 = vld [vmem:[%s382_s16 + $0x8] sm:$0xff] (!%p367_p13)  ;;  %s389_s8 = scalar_lea.vmem (!%p367_p13), [#allocation4], %s1321_s15  ;;  %s430_s9 = scalar_lea.vmem (!%p367_p13), [#allocation6], %s1321_s15 }
  0x31   : > { %1033 = vmatpush3.xpose.msra.mxu0 (!%p367_p13), %v447_v7  ;;  %v443_v9 = vld [vmem:[%s375_s17] sm:$0xff] (!%p367_p13)  ;;  %1038 = vmatpush3.xpose.msra.mxu1 (!%p367_p13), %v448_v8  ;;  %v444_v10 = vld [vmem:[%s375_s17 + $0x8] sm:$0xff] (!%p367_p13)  ;;  %s423_s10 = scalar_lea.vmem (!%p367_p13), [#allocation5], %s1321_s15  ;;  %s1348_s11 = scalar_lea.sflag (!%p367_p13), [#allocation7], %s373_s28 }
  0x32   : > { %v445_v11 = vmul.f32 (!%p367_p13), 0.088388346, %v443_v9  ;;  %v446_v12 = vmul.f32 (!%p367_p13), 0.088388346, %v444_v10  ;;  %1042 = vmatprep.subr.mxu0 (!%p367_p13), %v1199_v6  ;;  %1047 = vmatprep.subr.mxu1 (!%p367_p13), %v1199_v6  ;;  %v449_v33 = vld [vmem:[%s389_s8] sm:$0xff] (!%p367_p13)  ;;  %v450_v34 = vld [vmem:[%s389_s8 + $0x8] sm:$0xff] (!%p367_p13) }
  0x34   : > { %1035 = vmatmul.mubr.f32.vlgmr.msra.gmra.mrb[0].mxu0 (!%p367_p13), %v445_v11  ;;  %1040 = vmatmul.mubr.f32.vlgmr.msra.gmra.mrb[0].mxu1 (!%p367_p13), %v446_v12 }
  0x35   : > { %1044 = vmatprep.mubr.msk.f32.mxu0 %vm1200_vm0, %v1199_v6  ;;  %1049 = vmatprep.mubr.msk.f32.mxu1 %vm1200_vm0, %v1199_v6  ;;  %s1018_s12 = sshll.u32 (%p1277_p5), %s1189_s21, 3 }
  0x36   : > { %1043 = vmatpush3.msra.mxu0 %v449_v33  ;;  %1048 = vmatpush3.msra.mxu1 %v450_v34  ;;  %s786_s16 = scalar_lea.vmem (%p1277_p5), %s1413_s4, %s1018_s12 }
 0x107   : > { %v517_v15 = vpop.f32.mrb[0].mxu0  ;;  %v587_v16 = vpop.f32.mrb[0].mxu1 }
 0x108   : > { %v595_v17 = vsel %vm593_vm1, -1e+30, %v517_v15  ;;  %v1036_v18 = vpop.f32.mrb[1].mxu0  ;;  %v596_v19 = vsel %vm594_vm2, -1e+30, %v587_v16  ;;  %v1041_v20 = vpop.f32.mrb[1].mxu1 }
 0x109   : > { %v598_v21 = vsel %vm597_vm3, %v595_v17, -inf  ;;  %v601_v22 = vsel %vm597_vm3, %v596_v19, -inf }
 0x10a   : > { %599 = vmax.xlane.f32.xlu0 %v598_v21 }
 0x10e   : > { %602 = vmax.xlane.f32.xlu0 %v601_v22 }
 0x197   : > { %v600_v23 = vpop.xlane.xlu0 %599 }
 0x198   : > { %v604_v24 = vsub.f32 %v595_v17, %v600_v23 }
 0x19a   : > { %v606_v25 = vmul.f32 1.442695, %v604_v24 }
 0x19b   : > { %v603_v26 = vpop.xlane.xlu0 %602 }
 0x19c   : > { %1111 = vpow2.f32 %v606_v25  ;;  %v605_v27 = vsub.f32 %v596_v19, %v603_v26 }
 0x19e   : > { %v608_v28 = vmul.f32 1.442695, %v605_v27 }
 0x1a0   : > { %1113 = vpow2.f32 %v608_v28 }
 0x1a6   : > { %v1112_v29 = vpop.eup %1111 }
 0x1a7   : > { %v610_v30 = vsel %vm597_vm3, %v1112_v29, 0.0 }
 0x1a8   : > { %611 = vadd.xlane.f32.xlu1 %v610_v30 }
 0x1aa   : > { %v1114_v31 = vpop.eup %1113 }
 0x1ab   : > { %v613_v32 = vsel %vm597_vm3, %v1114_v31, 0.0 }
 0x1ac   : > { %614 = vadd.xlane.f32.xlu1 %v613_v32 }
 0x235   : > { %v612_v35 = vpop.xlane.xlu1 %611 }
 0x236   : > { %1115 = vrcp.f32 %v612_v35 }
 0x239   : > { %v615_v36 = vpop.xlane.xlu1 %614 }
 0x23a   : > { %1117 = vrcp.f32 %v615_v36 }
 0x240   : > { %v1116_v37 = vpop.eup %1115 }
 0x241   : > { %v618_v38 = vmul.f32 %v1116_v37, %v1112_v29 }
 0x243   : > { %620 = vst.msk [vmem:[%s430_s9] sm:$0xff] %vm597_vm3, %v618_v38  ;;  %1045 = vmatmul.mubr.msk.f32.vlgmr.msra.gmra.mrb[2].mxu0 %vm597_vm3, %v618_v38 }
 0x244   : > { %v1118_v39 = vpop.eup %1117 }
 0x245   : > { %v619_v40 = vmul.f32 %v1118_v39, %v1114_v31 }
 0x247   : > { %621 = vst.msk [vmem:[%s430_s9 + $0x8] sm:$0xff] %vm597_vm3, %v619_v40  ;;  %1050 = vmatmul.mubr.msk.f32.vlgmr.msra.gmra.mrb[2].mxu1 %vm597_vm3, %v619_v40 }
 0x315   : > { %781 = sbr.rel (!%p1277_p5) target bundleno = 804 (0x324), region = 154 }
 0x316   : > { %v691_v41 = vpop.f32.mrb[2].mxu0 }
 0x317   : > { %768 = vst [vmem:[%s423_s10] sm:$0xff] %v691_v41  ;;  %v1046_v42 = vpop.f32.mrb[3].mxu0 }
 0x31a   : > { %v764_v43 = vpop.f32.mrb[2].mxu1 }
 0x31b   : > { %769 = vst [vmem:[%s423_s10 + $0x8] sm:$0xff] %v764_v43  ;;  %v1051_v44 = vpop.f32.mrb[3].mxu1 }
 0x31e   : > { %v816_v45 = vld [vmem:[%s423_s10] sm:$0xff] }
 0x31f   : > { %817 = vst [vmem:[%s786_s16] sm:$0xff] %v816_v45 }
 0x322   : > { %v818_v46 = vld [vmem:[%s423_s10 + $0x8] sm:$0xff] }
 0x323   : > { %819 = vst [vmem:[%s786_s16 + $0x10] sm:$0xff] %v818_v46 }
 0x324 PF: > { %s1023_s15 = sshll.u32 %s1189_s21, 8  ;;  %s833_s17 = sshll.u32 %s430_s9, 4  ;;  %s1362_s17 = int_to_ptr.vmem [resolvable:$true] %s833_s17 }
 0x325   : > { %s1360_s25 = scalar_lea.hbm %s1414_s5, %s1023_s15  ;;  %s1119_s27 = scalar_lea.vmem %s1362_s17, 256 }
 0x326   : > { %p1120_p0 = scmp.ne.s32.totalorder %s1362_s17, %s1119_s27  ;;  %s1201_s30 = smov [#allocation6]  }
 0x327   : > { %s1123_s8 = sshll.u32 %s1201_s30, 4  ;;  %s1124_s8 = int_to_ptr.vmem [resolvable:$false] %s1123_s8 }
 0x328   : > { %p1121_p1 = pnand %p1120_p0, %p1277_p5  ;;  %s1125_s21 = scalar_lea.vmem %s1124_s8, 512 }
 0x329   : > { %p1126_p3 = scmp.lt.s32.totalorder %s1362_s17, %s1124_s8  ;;  %p1127_p4 = scmp.lt.s32.totalorder %s1125_s21, %s1119_s27 }
 0x32a   : > { %p1122_p2 = pneg %p1121_p1 }
 0x32b   : > { %p1128_p6 = por %p1127_p4, %p1126_p3 }
 0x32d   : > { %p1129_p7 = pnand %p1128_p6, %p1122_p2 }
 0x32f   : > { %1132 = shalt.err (!%p1129_p7)
}
 0x330   : > { %s1133_s9 = scalar_lea.hbm %s1360_s25, 256  ;;  %s1137_s13 = scalar_lea.hbm %s1414_s5, 512 }
 0x331   : > { %p1134_p8 = scmp.ne.s32.totalorder %s1360_s25, %s1133_s9  ;;  %p1138_p13 = scmp.lt.u32.totalorder %s1360_s25, %s1414_s5 }
 0x332   : > { %p1139_p0 = scmp.lt.u32.totalorder %s1137_s13, %s1133_s9  ;;  %p1141_p2 = scmp.lt.u32.totalorder %s1133_s9, %s1360_s25 }
 0x333   : > { %p1135_p11 = pnand %p1134_p8, %p1277_p5 }
 0x334   : > { %p1140_p1 = por %p1139_p0, %p1138_p13 }
 0x335   : > { %p1136_p12 = pneg %p1135_p11 }
 0x336   : > { %p1142_p3 = por %p1141_p2, %p1140_p1 }
 0x338   : > { %p1143_p4 = pnand %p1142_p3, %p1136_p12 }
 0x33a   : > { %1146 = shalt.err (!%p1143_p4)
}
 0x33b   : > { %s1202_s15 = smov 128   ;;  %s1203_s28 = smov 8  }
 0x33c   : > { %1052 = dma.vmem_to_hbm [thread:$0]  (%p1277_p5), %s1362_s17, 256, %s1360_s25, %s1348_s11, %s1202_s15, %s1202_s15, %s1203_s28  }
 0x33d PF: > { %s855_s24 = sand.u32 1, %s1177_s18   ;;  %p1055_p6 = pnand %p1001_p10, %p1288_p9 }
 0x33e   : > { %s856_s27 = scalar_lea.sflag [#allocation7], %s855_s24 }
 0x33f   : > { %1172 = dma.done.wait (!%p1055_p6), %s856_s27, 256  }
 0x340   : > { %1174 = vsyncadd (!%p1055_p6), %s856_s27, 4294967040  ;;  %s19_s23 = sadd.s32 1, %s1197_s23   ;;  %s1418_s18 = smov %s1181_s19 }
 0x341   : > { %p16_p7 = scmp.ge.s32.totalorder %s19_s23, 4   ;;  %s1419_s19 = smov %s1185_s20 }
 0x342   : > { %s1420_s20 = smov %s1286_s6  ;;  %s1421_s21 = smov %s1193_s22 }
 0x343   : > { %s1422_s22 = smov %s1424_s26  ;;  %18 = sbr.rel (!%p16_p7) target bundleno = 4 (0x4), region = 259 }
 0x34a   :  { %861 = vsyncpa [#allocation7], 1 }
 0x34b   :  { %863 = vsyncpa [#allocation7 + $0x1], 1 }

// kernel: multi_head_attention.9
= control target key start
LH: loop header
LB: loop body
LE: loop exit
PB: predicated region body
PF: predicated region fallthrough
CT: control target
= control target key end

     0   :  { %s707_s0 = inlined_call_operand.vmem [shape: f32[16,256], index: 0, kind: input, shape index: {}]   ;;  %s708_s1 = inlined_call_operand.vmem [shape: f32[256,256], index: 1, kind: input, shape index: {}]   ;;  %s709_s2 = inlined_call_operand.vmem [shape: f32[1,256], index: 2, kind: input, shape index: {}]   ;;  %s710_s3 = inlined_call_operand.vmem [shape: f32[16,256], index: 3, kind: input, shape index: {}]   ;;  %s711_s4 = inlined_call_operand.vmem [shape: f32[1,256], index: 4, kind: input, shape index: {}]   ;;  %s712_s5 = inlined_call_operand.vmem [shape: f32[1,256], index: 5, kind: input, shape index: {}]   ;;  %s713_s6 = inlined_call_operand.hbm [shape: f32[16,256], index: 6, kind: output, shape index: {}]  }
   0x1   :  { %v41_v0 = vld [vmem:[%s708_s1 + $0x8] sm:$0xff]  ;;  %v43_v1 = vld [vmem:[%s708_s1 + $0x18] sm:$0xff]  ;;  %v40_v2 = vld [vmem:[%s708_s1] sm:$0xff] }
   0x2   :  { %v305_v3 = vpack.c.bf16 %v43_v1, %v41_v0  ;;  %v42_v4 = vld [vmem:[%s708_s1 + $0x10] sm:$0xff]  ;;  %v45_v5 = vld [vmem:[%s708_s1 + $0x28] sm:$0xff]  ;;  %v47_v6 = vld [vmem:[%s708_s1 + $0x38] sm:$0xff] }
   0x3   :  { %v307_v7 = vpack.c.bf16 %v42_v4, %v40_v2  ;;  %v309_v8 = vpack.c.bf16 %v47_v6, %v45_v5  ;;  %v44_v9 = vld [vmem:[%s708_s1 + $0x20] sm:$0xff]  ;;  %v46_v10 = vld [vmem:[%s708_s1 + $0x30] sm:$0xff]  ;;  %v49_v11 = vld [vmem:[%s708_s1 + $0x48] sm:$0xff] }
   0x4   :  { %306 = vmatprep.subr.bf16.mxu0 %v305_v3  ;;  %369 = vmatprep.subr.bf16.mxu1 %v305_v3  ;;  %v51_v12 = vld [vmem:[%s708_s1 + $0x58] sm:$0xff]  ;;  %v311_v13 = vpack.c.bf16 %v46_v10, %v44_v9  ;;  %v48_v15 = vld [vmem:[%s708_s1 + $0x40] sm:$0xff]  ;;  %v50_v16 = vld [vmem:[%s708_s1 + $0x50] sm:$0xff] }
   0x5   :  { %308 = vmatpush1.bf16.msra.mxu0 %v307_v7  ;;  %385 = vmatpush1.bf16.msra.mxu1 %v307_v7  ;;  %v313_v14 = vpack.c.bf16 %v51_v12, %v49_v11  ;;  %v53_v17 = vld [vmem:[%s708_s1 + $0x68] sm:$0xff]  ;;  %v55_v18 = vld [vmem:[%s708_s1 + $0x78] sm:$0xff]  ;;  %v315_v19 = vpack.c.bf16 %v50_v16, %v48_v15  ;;  %v52_v21 = vld [vmem:[%s708_s1 + $0x60] sm:$0xff] }
   0x6   :  { %310 = vmatprep.subr.bf16.mxu0 %v309_v8  ;;  %370 = vmatprep.subr.bf16.mxu1 %v309_v8  ;;  %v317_v20 = vpack.c.bf16 %v55_v18, %v53_v17  ;;  %v54_v22 = vld [vmem:[%s708_s1 + $0x70] sm:$0xff]  ;;  %v57_v23 = vld [vmem:[%s708_s1 + $0x88] sm:$0xff]  ;;  %v59_v24 = vld [vmem:[%s708_s1 + $0x98] sm:$0xff] }
   0x7   :  { %v319_v25 = vpack.c.bf16 %v54_v22, %v52_v21  ;;  %v321_v26 = vpack.c.bf16 %v59_v24, %v57_v23  ;;  %v56_v27 = vld [vmem:[%s708_s1 + $0x80] sm:$0xff]  ;;  %v58_v28 = vld [vmem:[%s708_s1 + $0x90] sm:$0xff]  ;;  %v61_v29 = vld [vmem:[%s708_s1 + $0xa8] sm:$0xff] }
   0x8   :  { %v63_v30 = vld [vmem:[%s708_s1 + $0xb8] sm:$0xff]  ;;  %v323_v31 = vpack.c.bf16 %v58_v28, %v56_v27  ;;  %v60_v33 = vld [vmem:[%s708_s1 + $0xa0] sm:$0xff]  ;;  %v62_v34 = vld [vmem:[%s708_s1 + $0xb0] sm:$0xff] }
   0x9   :  { %312 = vmatpush1.bf16.msra.mxu0 %v311_v13  ;;  %386 = vmatpush1.bf16.msra.mxu1 %v311_v13  ;;  %v325_v32 = vpack.c.bf16 %v63_v30, %v61_v29  ;;  %v65_v35 = vld [vmem:[%s708_s1 + $0xc8] sm:$0xff]  ;;  %v67_v36 = vld [vmem:[%s708_s1 + $0xd8] sm:$0xff]  ;;  %v327_v37 = vpack.c.bf16 %v62_v34, %v60_v33  ;;  %v64_v38 = vld [vmem:[%s708_s1 + $0xc0] sm:$0xff] }
   0xa   :  { %314 = vmatprep.subr.bf16.mxu0 %v313_v14  ;;  %371 = vmatprep.subr.bf16.mxu1 %v313_v14  ;;  %v329_v39 = vpack.c.bf16 %v67_v36, %v65_v35  ;;  %v66_v40 = vld [vmem:[%s708_s1 + $0xd0] sm:$0xff]  ;;  %v69_v41 = vld [vmem:[%s708_s1 + $0xe8] sm:$0xff]  ;;  %v71_v43 = vld [vmem:[%s708_s1 + $0xf8] sm:$0xff] }
   0xb   :  { %v37_v42 = vld [vmem:[%s707_s0 + $0x8] sm:$0xff]  ;;  %v39_v44 = vld [vmem:[%s707_s0 + $0x18] sm:$0xff] }
   0xc   :  { %168 = vmatprep.mubr.f32.mxu0 %v37_v42 }
   0xd   :  { %316 = vmatpush1.bf16.msra.mxu0 %v315_v19  ;;  %387 = vmatpush1.bf16.msra.mxu1 %v315_v19 }
   0xe   :  { %318 = vmatprep.subr.bf16.mxu0 %v317_v20  ;;  %372 = vmatprep.subr.bf16.mxu1 %v317_v20 }
  0x11   :  { %320 = vmatpush1.bf16.msra.mxu0 %v319_v25  ;;  %388 = vmatpush1.bf16.msra.mxu1 %v319_v25 }
  0x12   :  { %322 = vmatprep.subr.bf16.mxu0 %v321_v26  ;;  %373 = vmatprep.subr.bf16.mxu1 %v321_v26 }
  0x15   :  { %324 = vmatpush1.bf16.msra.mxu0 %v323_v31  ;;  %389 = vmatpush1.bf16.msra.mxu1 %v323_v31 }
  0x16   :  { %326 = vmatprep.subr.bf16.mxu0 %v325_v32  ;;  %374 = vmatprep.subr.bf16.mxu1 %v325_v32 }
  0x17   :  { %11 = vsyncpa [#allocation4], 0  ;;  %174 = vmatprep.mubr.f32.mxu1 %v39_v44  ;;  %v331_v45 = vpack.c.bf16 %v66_v40, %v64_v38  ;;  %v333_v46 = vpack.c.bf16 %v71_v43, %v69_v41  ;;  %v68_v47 = vld [vmem:[%s708_s1 + $0xe0] sm:$0xff]  ;;  %v70_v48 = vld [vmem:[%s708_s1 + $0xf0] sm:$0xff]  ;;  %v198_v36 = vlaneseq  ;;  %s432_s23 = smov [#allocation3]  }
  0x18   :  { %v73_v49 = vld [vmem:[%s708_s1 + $0x108] sm:$0xff]  ;;  %v75_v50 = vld [vmem:[%s708_s1 + $0x118] sm:$0xff]  ;;  %v335_v51 = vpack.c.bf16 %v70_v48, %v68_v47  ;;  %v72_v53 = vld [vmem:[%s708_s1 + $0x100] sm:$0xff] }
  0x19   :  { %328 = vmatpush1.bf16.msra.mxu0 %v327_v37  ;;  %390 = vmatpush1.bf16.msra.mxu1 %v327_v37  ;;  %v337_v52 = vpack.c.bf16 %v75_v50, %v73_v49  ;;  %v74_v54 = vld [vmem:[%s708_s1 + $0x110] sm:$0xff]  ;;  %v77_v55 = vld [vmem:[%s708_s1 + $0x128] sm:$0xff]  ;;  %v79_v56 = vld [vmem:[%s708_s1 + $0x138] sm:$0xff]  ;;  %v199_v37 = vshrl.u32 %v198_v36, 7 }
  0x1a   :  { %330 = vmatprep.subr.bf16.mxu0 %v329_v39  ;;  %375 = vmatprep.subr.bf16.mxu1 %v329_v39  ;;  %v339_v57 = vpack.c.bf16 %v74_v54, %v72_v53  ;;  %v341_v58 = vpack.c.bf16 %v79_v56, %v77_v55  ;;  %v76_v59 = vld [vmem:[%s708_s1 + $0x120] sm:$0xff]  ;;  %v78_v60 = vld [vmem:[%s708_s1 + $0x130] sm:$0xff]  ;;  %v81_v61 = vld [vmem:[%s708_s1 + $0x148] sm:$0xff] }
  0x1b   :  { %v83_v62 = vld [vmem:[%s708_s1 + $0x158] sm:$0xff]  ;;  %v343_v63 = vpack.c.bf16 %v78_v60, %v76_v59  ;;  %v80_v1 = vld [vmem:[%s708_s1 + $0x140] sm:$0xff]  ;;  %v82_v2 = vld [vmem:[%s708_s1 + $0x150] sm:$0xff]  ;;  %v200_v38 = vsub.s32 0, %v199_v37  ;;  %v204_v40 = vsub.s32 1, %v199_v37 }
  0x1c   :  { %v345_v0 = vpack.c.bf16 %v83_v62, %v81_v61  ;;  %v85_v3 = vld [vmem:[%s708_s1 + $0x168] sm:$0xff]  ;;  %v87_v4 = vld [vmem:[%s708_s1 + $0x178] sm:$0xff]  ;;  %v347_v5 = vpack.c.bf16 %v82_v2, %v80_v1  ;;  %v84_v7 = vld [vmem:[%s708_s1 + $0x160] sm:$0xff] }
  0x1d   :  { %332 = vmatpush1.bf16.msra.mxu0 %v331_v45  ;;  %391 = vmatpush1.bf16.msra.mxu1 %v331_v45  ;;  %v349_v6 = vpack.c.bf16 %v87_v4, %v85_v3  ;;  %v86_v8 = vld [vmem:[%s708_s1 + $0x170] sm:$0xff]  ;;  %v89_v9 = vld [vmem:[%s708_s1 + $0x188] sm:$0xff]  ;;  %v91_v10 = vld [vmem:[%s708_s1 + $0x198] sm:$0xff] }
  0x1e   :  { %334 = vmatprep.subr.bf16.mxu0 %v333_v46  ;;  %376 = vmatprep.subr.bf16.mxu1 %v333_v46  ;;  %v351_v11 = vpack.c.bf16 %v86_v8, %v84_v7  ;;  %v353_v12 = vpack.c.bf16 %v91_v10, %v89_v9  ;;  %v88_v13 = vld [vmem:[%s708_s1 + $0x180] sm:$0xff]  ;;  %v90_v14 = vld [vmem:[%s708_s1 + $0x190] sm:$0xff]  ;;  %v93_v15 = vld [vmem:[%s708_s1 + $0x1a8] sm:$0xff] }
  0x1f   :  { %v95_v16 = vld [vmem:[%s708_s1 + $0x1b8] sm:$0xff]  ;;  %v355_v17 = vpack.c.bf16 %v90_v14, %v88_v13  ;;  %v92_v19 = vld [vmem:[%s708_s1 + $0x1a0] sm:$0xff]  ;;  %v94_v20 = vld [vmem:[%s708_s1 + $0x1b0] sm:$0xff] }
  0x20   :  { %v357_v18 = vpack.c.bf16 %v95_v16, %v93_v15  ;;  %v97_v21 = vld [vmem:[%s708_s1 + $0x1c8] sm:$0xff]  ;;  %v99_v22 = vld [vmem:[%s708_s1 + $0x1d8] sm:$0xff]  ;;  %v359_v23 = vpack.c.bf16 %v94_v20, %v92_v19  ;;  %v96_v25 = vld [vmem:[%s708_s1 + $0x1c0] sm:$0xff] }
  0x21   :  { %336 = vmatpush1.bf16.msra.mxu0 %v335_v51  ;;  %392 = vmatpush1.bf16.msra.mxu1 %v335_v51  ;;  %v361_v24 = vpack.c.bf16 %v99_v22, %v97_v21  ;;  %v98_v26 = vld [vmem:[%s708_s1 + $0x1d0] sm:$0xff]  ;;  %v101_v27 = vld [vmem:[%s708_s1 + $0x1e8] sm:$0xff]  ;;  %v103_v28 = vld [vmem:[%s708_s1 + $0x1f8] sm:$0xff] }
  0x22   :  { %338 = vmatprep.subr.bf16.mxu0 %v337_v52  ;;  %377 = vmatprep.subr.bf16.mxu1 %v337_v52  ;;  %v363_v29 = vpack.c.bf16 %v98_v26, %v96_v25  ;;  %v365_v30 = vpack.c.bf16 %v103_v28, %v101_v27  ;;  %v100_v31 = vld [vmem:[%s708_s1 + $0x1e0] sm:$0xff]  ;;  %v102_v32 = vld [vmem:[%s708_s1 + $0x1f0] sm:$0xff]  ;;  %v215_v51 = vld [vmem:[%s710_s3 + $0x18] sm:$0xff] }
  0x23   :  { %v367_v33 = vpack.c.bf16 %v102_v32, %v100_v31  ;;  %v36_v34 = vld [vmem:[%s707_s0] sm:$0xff]  ;;  %v38_v35 = vld [vmem:[%s707_s0 + $0x10] sm:$0xff]  ;;  %v213_v52 = vld [vmem:[%s710_s3 + $0x8] sm:$0xff] }
  0x24   :  { %v196_v39 = vld [vmem:[%s709_s2] sm:$0x3]  ;;  %v214_v49 = vld [vmem:[%s710_s3 + $0x10] sm:$0xff] }
  0x25   :  { %340 = vmatpush1.bf16.msra.mxu0 %v339_v57  ;;  %393 = vmatpush1.bf16.msra.mxu1 %v339_v57  ;;  %v201_v41 = vrot.slane %v196_v39, %v200_v38  ;;  %v205_v42 = vrot.slane %v196_v39, %v204_v40  ;;  %v212_v45 = vld [vmem:[%s710_s3] sm:$0xff] }
  0x26   :  { %342 = vmatprep.subr.bf16.mxu0 %v341_v58  ;;  %378 = vmatprep.subr.bf16.mxu1 %v341_v58 }
  0x29   :  { %344 = vmatpush1.bf16.msra.mxu0 %v343_v63  ;;  %394 = vmatpush1.bf16.msra.mxu1 %v343_v63 }
  0x2a   :  { %346 = vmatprep.subr.bf16.mxu0 %v345_v0  ;;  %379 = vmatprep.subr.bf16.mxu1 %v345_v0 }
  0x2d   :  { %348 = vmatpush1.bf16.msra.mxu0 %v347_v5  ;;  %395 = vmatpush1.bf16.msra.mxu1 %v347_v5 }
  0x2e   :  { %350 = vmatprep.subr.bf16.mxu0 %v349_v6  ;;  %380 = vmatprep.subr.bf16.mxu1 %v349_v6 }
  0x31   :  { %352 = vmatpush1.bf16.msra.mxu0 %v351_v11  ;;  %396 = vmatpush1.bf16.msra.mxu1 %v351_v11 }
  0x32   :  { %354 = vmatprep.subr.bf16.mxu0 %v353_v12  ;;  %381 = vmatprep.subr.bf16.mxu1 %v353_v12 }
  0x35   :  { %356 = vmatpush1.bf16.msra.mxu0 %v355_v17  ;;  %397 = vmatpush1.bf16.msra.mxu1 %v355_v17  ;;  %v253_v17 = vld [vmem:[%s711_s4] sm:$0x3]  ;;  %s294_s4 = sshll.u32 %s432_s23, 4  ;;  %s295_s4 = int_to_ptr.vmem [resolvable:$true] %s294_s4 }
  0x36   :  { %358 = vmatprep.subr.bf16.mxu0 %v357_v18  ;;  %382 = vmatprep.subr.bf16.mxu1 %v357_v18  ;;  %v269_v18 = vld [vmem:[%s712_s5] sm:$0x3]  ;;  %v258_v19 = vrot.slane %v253_v17, %v200_v38  ;;  %v262_v20 = vrot.slane %v253_v17, %v204_v40  ;;  %s408_s5 = scalar_lea.vmem %s295_s4, 512  ;;  %p413_p1 = scmp.lt.s32.totalorder %s295_s4, %s295_s4 }
  0x37   :  { %v274_v22 = vrot.slane %v269_v18, %v200_v38  ;;  %p409_p0 = scmp.ne.s32.totalorder %s295_s4, %s408_s5  ;;  %p414_p2 = scmp.lt.s32.totalorder %s408_s5, %s408_s5 }
  0x39   :  { %360 = vmatpush1.bf16.msra.mxu0 %v359_v23  ;;  %398 = vmatpush1.bf16.msra.mxu1 %v359_v23  ;;  %v278_v23 = vrot.slane %v269_v18, %v204_v40  ;;  %p415_p3 = por %p414_p2, %p413_p1 }
  0x3a   :  { %362 = vmatprep.subr.bf16.mxu0 %v361_v24  ;;  %383 = vmatprep.subr.bf16.mxu1 %v361_v24 }
  0x3b   :  { %p416_p4 = pnand %p415_p3, %p409_p0 }
  0x3d   :  { %364 = vmatpush1.bf16.msra.mxu0 %v363_v29  ;;  %399 = vmatpush1.bf16.msra.mxu1 %v363_v29 }
  0x3e   :  { %366 = vmatprep.subr.bf16.mxu0 %v365_v30  ;;  %384 = vmatprep.subr.bf16.mxu1 %v365_v30 }
  0x41   :  { %368 = vmatpush1.bf16.msra.mxu0 %v367_v33  ;;  %400 = vmatpush1.bf16.msra.mxu1 %v367_v33 }
  0x44   :  { %169 = vmatmul.mubr.f32.vlgmr.msra.gmra.mrb[0].mxu0 %v36_v34  ;;  %175 = vmatmul.mubr.f32.vlgmr.msra.gmra.mrb[0].mxu1 %v38_v35 }
 0x117   :  { %v170_v43 = vpop.f32.mrb[0].mxu0  ;;  %v176_v44 = vpop.f32.mrb[0].mxu1 }
 0x118   :  { %v208_v46 = vadd.f32 %v201_v41, %v170_v43  ;;  %v172_v47 = vpop.f32.mrb[1].mxu0  ;;  %v210_v48 = vadd.f32 %v201_v41, %v176_v44  ;;  %v178_v50 = vpop.f32.mrb[1].mxu1 }
 0x119   :  { %v209_v53 = vadd.f32 %v205_v42, %v172_v47  ;;  %v211_v54 = vadd.f32 %v205_v42, %v178_v50 }
 0x11a   :  { %v216_v55 = vadd.f32 %v212_v45, %v208_v46  ;;  %v218_v56 = vadd.f32 %v214_v49, %v210_v48 }
 0x11b   :  { %v219_v57 = vadd.f32 %v215_v51, %v211_v54  ;;  %v217_v58 = vadd.f32 %v213_v52, %v209_v53 }
 0x11d   :  { %v220_v59 = vadd.f32 %v217_v58, %v216_v55  ;;  %v223_v60 = vadd.f32 %v219_v57, %v218_v56 }
 0x11f   :  { %221 = vadd.xlane.f32.xlu0 %v220_v59 }
 0x123   :  { %224 = vadd.xlane.f32.xlu0 %v223_v60 }
 0x1ac   :  { %v222_v61 = vpop.xlane.xlu0 %221 }
 0x1ad   :  { %v227_v62 = vmul.f32 0.00390625, %v222_v61 }
 0x1af   :  { %v229_v63 = vsub.f32 %v216_v55, %v227_v62  ;;  %v230_v0 = vsub.f32 %v217_v58, %v227_v62 }
 0x1b0   :  { %v225_v1 = vpop.xlane.xlu0 %224 }
 0x1b1   :  { %v228_v2 = vmul.f32 0.00390625, %v225_v1  ;;  %v233_v3 = vmul.f32 %v229_v63, %v229_v63  ;;  %v234_v4 = vmul.f32 %v230_v0, %v230_v0 }
 0x1b3   :  { %v231_v5 = vsub.f32 %v218_v56, %v228_v2  ;;  %v232_v6 = vsub.f32 %v219_v57, %v228_v2  ;;  %v237_v7 = vadd.f32 %v234_v4, %v233_v3 }
 0x1b5   :  { %238 = vadd.xlane.f32.xlu1 %v237_v7  ;;  %v235_v8 = vmul.f32 %v231_v5, %v231_v5  ;;  %v236_v9 = vmul.f32 %v232_v6, %v232_v6 }
 0x1b7   :  { %v240_v10 = vadd.f32 %v236_v9, %v235_v8 }
 0x1b9   :  { %241 = vadd.xlane.f32.xlu1 %v240_v10 }
 0x242   :  { %v239_v11 = vpop.xlane.xlu1 %238 }
 0x243   :  { %v243_v12 = vmul.f32 0.00390625, %v239_v11 }
 0x245   :  { %v245_v13 = vadd.f32 1e-05, %v243_v12 }
 0x246   :  { %v242_v14 = vpop.xlane.xlu1 %241 }
 0x247   :  { %404 = vrsqrt.f32 %v245_v13  ;;  %v244_v15 = vmul.f32 0.00390625, %v242_v14 }
 0x249   :  { %v246_v16 = vadd.f32 1e-05, %v244_v15 }
 0x24b   :  { %406 = vrsqrt.f32 %v246_v16 }
 0x251   :  { %v405_v21 = vpop.eup %404 }
 0x252   :  { %v249_v24 = vmul.f32 %v405_v21, %v229_v63  ;;  %v250_v25 = vmul.f32 %v405_v21, %v230_v0 }
 0x254   :  { %v265_v26 = vmul.f32 %v258_v19, %v249_v24  ;;  %v266_v27 = vmul.f32 %v262_v20, %v250_v25 }
 0x255   :  { %v407_v28 = vpop.eup %406 }
 0x256   :  { %v251_v29 = vmul.f32 %v407_v28, %v231_v5  ;;  %v252_v30 = vmul.f32 %v407_v28, %v232_v6  ;;  %v281_v31 = vadd.f32 %v274_v22, %v265_v26  ;;  %v282_v32 = vadd.f32 %v278_v23, %v266_v27 }
 0x258   :  { %v267_v33 = vmul.f32 %v258_v19, %v251_v29  ;;  %v268_v34 = vmul.f32 %v262_v20, %v252_v30  ;;  %285 = vst [vmem:[#allocation3] sm:$0xff] %v281_v31  ;;  %286 = vst [vmem:[#allocation3 + $0x8] sm:$0xff] %v282_v32 }
 0x25a   :  { %v283_v35 = vadd.f32 %v274_v22, %v267_v33  ;;  %v284_v36 = vadd.f32 %v278_v23, %v268_v34 }
 0x25c   :  { %287 = vst [vmem:[#allocation3 + $0x10] sm:$0xff] %v283_v35  ;;  %288 = vst [vmem:[#allocation3 + $0x18] sm:$0xff] %v284_v36 }
 0x25d   :  { %419 = shalt.err (!%p416_p4)
}
 0x25e   :  { %s420_s26 = scalar_lea.hbm %s713_s6, 512 }
 0x25f   :  { %p421_p5 = scmp.ne.s32.totalorder %s713_s6, %s420_s26  ;;  %p424_p6 = scmp.lt.u32.totalorder %s420_s26, %s713_s6 }
 0x261   :  { %p426_p7 = pnand %p424_p6, %p421_p5 }
 0x263   :  { %429 = shalt.err (!%p426_p7)
}
 0x264   :  { %s433_s7 = smov 256   ;;  %s434_s8 = smov 16  }
 0x265   :  { %300 = dma.vmem_to_hbm [thread:$0]  %s295_s4, 512, %s713_s6, [#allocation4], %s433_s7, %s433_s7, %s434_s8  }
 0x266   :  { %430 = dma.done.wait [#allocation4], 512  }
 0x267   :  { %431 = vsyncadd [#allocation4], 4294966784 }
 0x268   :  { %304 = vsyncpa [#allocation4], 1 }

</bundles_post_ra>
